<compile_context>
chip_gen: v7x
topology: tpu7x:2x2x1
jax: 0.10.0
libtpu: 0.0.40
codegen_flags: <defaults>
</compile_context>

<pallas_src>
import functools

import jax
import jax.numpy as jnp
from jax import lax
from jax.experimental import pallas as pl
from jax.experimental.pallas import tpu as pltpu


def _hardswish(x):
    # torch.nn.Hardswish: x * relu6(x + 3) / 6
    return x * jnp.clip(x + 3.0, 0.0, 6.0) * (1.0 / 6.0)


# Left padding inside the y1 scratch so the interior store lands on a
# sublane-aligned offset (8); columns _PAD-1 and _PAD+W are the zero halo.
_PAD = 8


# ---------------------------------------------------------------------------
# Fused kernel: cv1(1x1) -> cv2(3x3) -> (+x) on a (TR, W) row tile (+- 1 halo row)
# ---------------------------------------------------------------------------
def _bottleneck_kernel(xt_ref, xm_ref, xb_ref, w1_ref, b1_ref, w2_ref, b2_ref,
                       o_ref, y1p_ref, *, add, compute_dtype):
    TRp2, Wpad, Cm = y1p_ref.shape
    TR, W = TRp2 - 2, Wpad - _PAD - 1
    C1 = xm_ref.shape[-1]
    C2 = o_ref.shape[-1]
    r = pl.program_id(1)

    def cv1(x2d):  # [rows, C1] -> [rows, Cm] f32 (BN scale already in w1)
        y = jnp.dot(x2d.astype(compute_dtype), w1_ref[...],
                    preferred_element_type=jnp.float32)
        return _hardswish(y + b1_ref[...])

    # Zero the scratch: keeps the left/right halo columns (and masked halo
    # rows) at 0, which is exactly cv2's zero padding of the cv1 output.
    y1p_ref[...] = jnp.zeros_like(y1p_ref)

    # cv1 on the TR interior rows of this tile.
    y1_mid = cv1(xm_ref[...].reshape(TR * W, C1))
    y1p_ref[1:TR + 1, _PAD:_PAD + W, :] = y1_mid.reshape(TR, W, Cm)

    # cv1 on the two halo rows; rows falling outside the image contribute 0.
    y1_top = cv1(xt_ref[0])
    y1_top = jnp.where(r > 0, y1_top, 0.0)
    y1p_ref[0, _PAD:_PAD + W, :] = y1_top

    y1_bot = cv1(xb_ref[0])
    y1_bot = jnp.where(r < pl.num_programs(1) - 1, y1_bot, 0.0)
    y1p_ref[TR + 1, _PAD:_PAD + W, :] = y1_bot

    # cv2: 3x3 conv as 9 shifted matmuls accumulated in f32.
    acc = jnp.zeros((TR * W, C2), jnp.float32)
    for t in range(9):
        kh, kw = t // 3, t % 3
        c0 = _PAD - 1 + kw
        tap = y1p_ref[kh:kh + TR, c0:c0 + W, :]
        acc = acc + jnp.dot(tap.reshape(TR * W, Cm).astype(compute_dtype),
                            w2_ref[t], preferred_element_type=jnp.float32)
    y2 = _hardswish(acc + b2_ref[...])

    if add:  # residual reuses the x tile already in VMEM (exact f32 add)
        y2 = y2 + xm_ref[...].reshape(TR * W, C1).astype(jnp.float32)

    o_ref[...] = y2.reshape(TR, W, C2).astype(o_ref.dtype)


# ---------------------------------------------------------------------------
# Wrapper
# ---------------------------------------------------------------------------
def _pick_tile_rows(H, W, C1, Cm, C2, budget=8 * 1024 * 1024):
    """Largest divisor of H whose per-step live VMEM stays under `budget`
    (conservative so it also fits v7x's smaller VMEM)."""
    best = 1
    for tr in range(1, H + 1):
        if H % tr:
            continue
        x_tiles = 2 * (tr + 2) * W * C1 * 4      # double-buffered x rows (+halo)
        out_tile = 2 * tr * W * C2 * 4           # double-buffered output tile
        scratch = (tr + 2) * (W + _PAD + 1) * Cm * 4
        live = tr * W * (C2 + Cm) * 4            # acc + y1 values in flight
        if x_tiles + out_tile + scratch + live <= budget:
            best = tr
    return best


def bottleneck_forward(x_nchw, params, *, shortcut=True, tile_rows=None,
                       compute_dtype=jnp.bfloat16, eps=1e-5):
    N, C1, H, W = x_nchw.shape
    w1 = params["w1"]                  # [Cm, C1, 1, 1]  (PyTorch OIHW)
    w2 = params["w2"]                  # [C2, Cm, 3, 3]
    Cm, C2 = w1.shape[0], w2.shape[0]
    add = bool(shortcut) and (C1 == C2)

    # Fold eval-mode BatchNorm into the bias-free convs: scale -> weights, rest -> bias.
    s1 = params["g1"] / jnp.sqrt(params["v1"] + eps)
    b1 = (params["b1"] - params["m1"] * s1).astype(jnp.float32).reshape(1, Cm)
    s2 = params["g2"] / jnp.sqrt(params["v2"] + eps)
    b2 = (params["b2"] - params["m2"] * s2).astype(jnp.float32).reshape(1, C2)
    w1_mat = (w1[:, :, 0, 0].T * s1[None, :]).astype(compute_dtype)          # [C1, Cm]
    w2_mat = (jnp.transpose(w2, (2, 3, 1, 0)).reshape(9, Cm, C2)
              * s2[None, None, :]).astype(compute_dtype)                     # [9, Cm, C2], t = kh*3+kw

    # NCHW -> NHWC (layout glue only; channels on the lane axis).
    x = jnp.transpose(x_nchw, (0, 2, 3, 1))

    TR = tile_rows if tile_rows is not None else _pick_tile_rows(H, W, C1, Cm, C2)
    assert H % TR == 0, (H, TR)
    grid = (N, H // TR)

    # Halo rows are fetched with clamped indices; the kernel zero-masks them
    # when they fall outside the image (so no pre-padding of x is needed).
    row_top = lambda n, r: (n, jnp.maximum(r * TR - 1, 0), 0, 0)
    row_mid = lambda n, r: (n, r, 0, 0)
    row_bot = lambda n, r: (n, jnp.minimum(r * TR + TR, H - 1), 0, 0)

    out = pl.pallas_call(
        functools.partial(_bottleneck_kernel, add=add, compute_dtype=compute_dtype),
        out_shape=jax.ShapeDtypeStruct((N, H, W, C2), x_nchw.dtype),
        grid=grid,
        in_specs=[
            pl.BlockSpec((None, 1, W, C1), row_top),    # top halo row
            pl.BlockSpec((None, TR, W, C1), row_mid),   # TR interior rows
            pl.BlockSpec((None, 1, W, C1), row_bot),    # bottom halo row
            pl.BlockSpec((C1, Cm), lambda n, r: (0, 0)),
            pl.BlockSpec((1, Cm), lambda n, r: (0, 0)),
            pl.BlockSpec((9, Cm, C2), lambda n, r: (0, 0, 0)),
            pl.BlockSpec((1, C2), lambda n, r: (0, 0)),
        ],
        out_specs=pl.BlockSpec((None, TR, W, C2), row_mid),
        scratch_shapes=[pltpu.VMEM((TR + 2, W + _PAD + 1, Cm), jnp.float32)],
        compiler_params=pltpu.CompilerParams(
            dimension_semantics=("parallel", "parallel")),
    )(x, x, x, w1_mat, b1, w2_mat, b2)

    return jnp.transpose(out, (0, 3, 1, 2))  # NHWC -> NCHW


# ---------------------------------------------------------------------------
# Pure-JAX reference (mirrors the PyTorch NCHW forward, eval-mode BN)
# ---------------------------------------------------------------------------
def _reference(x, params, *, shortcut=True, eps=1e-5):
    dn = ("NCHW", "OIHW", "NCHW")

    def bn(y, g, b, m, v):
        g = g[None, :, None, None]
        b = b[None, :, None, None]
        m = m[None, :, None, None]
        v = v[None, :, None, None]
        return (y - m) / jnp.sqrt(v + eps) * g + b

    y = lax.conv_general_dilated(x, params["w1"], (1, 1), [(0, 0), (0, 0)],
                                 dimension_numbers=dn)
    y = _hardswish(bn(y, params["g1"], params["b1"], params["m1"], params["v1"]))
    y = lax.conv_general_dilated(y, params["w2"], (1, 1), [(1, 1), (1, 1)],
                                 dimension_numbers=dn)
    y = _hardswish(bn(y, params["g2"], params["b2"], params["m2"], params["v2"]))
    add = shortcut and x.shape[1] == y.shape[1]
    return x + y if add else y


if __name__ == "__main__":
    key = jax.random.PRNGKey(0)
    N, C1, H, W = 2, 8, 16, 16
    C2, e = 8, 0.5
    Cm = int(C2 * e)

    keys = jax.random.split(key, 11)
    x = jax.random.normal(keys[0], (N, C1, H, W), jnp.float32)
    params = dict(
        w1=jax.random.normal(keys[1], (Cm, C1, 1, 1), jnp.float32) * 0.5,
        g1=jax.random.uniform(keys[2], (Cm,), jnp.float32, minval=0.5, maxval=1.5),
        b1=jax.random.normal(keys[3], (Cm,), jnp.float32) * 0.1,
        m1=jax.random.normal(keys[4], (Cm,), jnp.float32) * 0.1,
        v1=jax.random.uniform(keys[5], (Cm,), jnp.float32, minval=0.5, maxval=1.5),
        w2=jax.random.normal(keys[6], (C2, Cm, 3, 3), jnp.float32) * 0.2,
        g2=jax.random.uniform(keys[7], (C2,), jnp.float32, minval=0.5, maxval=1.5),
        b2=jax.random.normal(keys[8], (C2,), jnp.float32) * 0.1,
        m2=jax.random.normal(keys[9], (C2,), jnp.float32) * 0.1,
        v2=jax.random.uniform(keys[10], (C2,), jnp.float32, minval=0.5, maxval=1.5),
    )

    ref = jax.block_until_ready(_reference(x, params, shortcut=True))

    # Tight numerical check with f32 matmuls.
    out_f32 = jax.block_until_ready(
        bottleneck_forward(x, params, shortcut=True, compute_dtype=jnp.float32))
    assert out_f32.shape == (N, C2, H, W), out_f32.shape
    err = float(jnp.max(jnp.abs(out_f32 - ref)))
    assert jnp.allclose(out_f32, ref, rtol=1e-4, atol=1e-4), err

    # No-shortcut branch (add=False path), f32 matmuls.
    ref_ns = _reference(x, params, shortcut=False)
    out_ns = jax.block_until_ready(
        bottleneck_forward(x, params, shortcut=False, compute_dtype=jnp.float32))
    assert jnp.allclose(out_ns, ref_ns, rtol=1e-4, atol=1e-4)

    # Default (performance) path: bf16 matmuls, f32 accumulation — looser tol.
    out = jax.block_until_ready(bottleneck_forward(x, params, shortcut=True))
    assert out.shape == (N, C2, H, W), out.shape
    err_bf16 = float(jnp.max(jnp.abs(out - ref)))
    assert jnp.allclose(out, ref, rtol=5e-2, atol=2e-1), err_bf16

    print("KERNEL_OK")
</pallas_src>

<mosaic_0001>
module attributes {stable_mosaic.version = 11 : i64} {
  func.func @_bottleneck_kernel(%arg0: i32, %arg1: i32, %arg2: memref<1x1x16x8xf32, #tpu.memory_space<vmem>>, %arg3: memref<1x16x16x8xf32, #tpu.memory_space<vmem>>, %arg4: memref<1x1x16x8xf32, #tpu.memory_space<vmem>>, %arg5: memref<8x4xf32, #tpu.memory_space<vmem>>, %arg6: memref<1x4xf32, #tpu.memory_space<vmem>>, %arg7: memref<9x4x8xf32, #tpu.memory_space<vmem>>, %arg8: memref<1x8xf32, #tpu.memory_space<vmem>>, %arg9: memref<1x16x16x8xf32, #tpu.memory_space<vmem>>, %arg10: memref<18x25x4xf32, #tpu.memory_space<vmem>>) attributes {dimension_semantics = [#tpu.dimension_semantics<parallel>, #tpu.dimension_semantics<parallel>], iteration_bounds = array<i64: 2, 1>, scalar_prefetch = 0 : i64, scratch_operands = 1 : i64, tpu.core_type = #tpu.core_type<tc>, window_params = [{transform_indices = @transform_0, window_bounds = array<i64: 1, 1, 16, 8>}, {transform_indices = @transform_1, window_bounds = array<i64: 1, 16, 16, 8>}, {transform_indices = @transform_2, window_bounds = array<i64: 1, 1, 16, 8>}, {pipeline_mode = #tpu.pipeline_mode<synchronous>, transform_indices = @transform_3, window_bounds = array<i64: 8, 4>}, {pipeline_mode = #tpu.pipeline_mode<synchronous>, transform_indices = @transform_4, window_bounds = array<i64: 1, 4>}, {pipeline_mode = #tpu.pipeline_mode<synchronous>, transform_indices = @transform_5, window_bounds = array<i64: 9, 4, 8>}, {pipeline_mode = #tpu.pipeline_mode<synchronous>, transform_indices = @transform_6, window_bounds = array<i64: 1, 8>}, {transform_indices = @transform_7, window_bounds = array<i64: 1, 16, 16, 8>}]} {
    %cst = arith.constant 0.000000e+00 : f32
    %0 = vector.broadcast %cst : f32 to vector<18x25x4xf32>
    %c0 = arith.constant 0 : index
    %c0_0 = arith.constant 0 : index
    %c0_1 = arith.constant 0 : index
    %1 = vector.load %arg10[%c0, %c0_0, %c0_1] : memref<18x25x4xf32, #tpu.memory_space<vmem>>, vector<18x25x4xf32>
    tpu.vector_store %arg10[%c0, %c0_0, %c0_1], %0 {strides = array<i32>} : memref<18x25x4xf32, #tpu.memory_space<vmem>>, vector<18x25x4xf32>,
    %c0_2 = arith.constant 0 : index
    %c0_3 = arith.constant 0 : index
    %c0_4 = arith.constant 0 : index
    %c0_5 = arith.constant 0 : index
    %2 = vector.load %arg3[%c0_2, %c0_3, %c0_4, %c0_5] : memref<1x16x16x8xf32, #tpu.memory_space<vmem>>, vector<1x16x16x8xf32>
    %3 = vector.shape_cast %2 : vector<1x16x16x8xf32> to vector<16x16x8xf32>
    %4 = vector.shape_cast %3 : vector<16x16x8xf32> to vector<256x8xf32>
    %c0_6 = arith.constant 0 : index
    %c0_7 = arith.constant 0 : index
    %5 = vector.load %arg5[%c0_6, %c0_7] : memref<8x4xf32, #tpu.memory_space<vmem>>, vector<8x4xf32>
    %cst_8 = arith.constant dense<0.000000e+00> : vector<256x4xf32>
    %6 = tpu.matmul %4, %5, %cst_8 {dimension_numbers = #tpu.dot_dimension_numbers<[1], [0], [0], [1], [0, 0, 1, 1], [], []>} : vector<256x8xf32>, vector<8x4xf32>, vector<256x4xf32> -> vector<256x4xf32>
    %c0_9 = arith.constant 0 : index
    %c0_10 = arith.constant 0 : index
    %7 = vector.load %arg6[%c0_9, %c0_10] : memref<1x4xf32, #tpu.memory_space<vmem>>, vector<1x4xf32>
    %8 = vector.broadcast %7 : vector<1x4xf32> to vector<256x4xf32>
    %9 = arith.addf %6, %8 : vector<256x4xf32>
    %cst_11 = arith.constant 3.000000e+00 : f32
    %10 = vector.broadcast %cst_11 : f32 to vector<256x4xf32>
    %11 = arith.addf %9, %10 : vector<256x4xf32>
    %cst_12 = arith.constant 0.000000e+00 : f32
    %cst_13 = arith.constant 6.000000e+00 : f32
    %12 = vector.broadcast %cst_12 : f32 to vector<256x4xf32>
    %13 = arith.maximumf %12, %11 : vector<256x4xf32>
    %14 = vector.broadcast %cst_13 : f32 to vector<256x4xf32>
    %15 = arith.minimumf %14, %13 : vector<256x4xf32>
    %16 = arith.mulf %9, %15 : vector<256x4xf32>
    %cst_14 = arith.constant 0.166666672 : f32
    %17 = vector.broadcast %cst_14 : f32 to vector<256x4xf32>
    %18 = arith.mulf %16, %17 : vector<256x4xf32>
    %19 = vector.shape_cast %18 : vector<256x4xf32> to vector<16x16x4xf32>
    %c1 = arith.constant 1 : index
    %c8 = arith.constant 8 : index
    %c0_15 = arith.constant 0 : index
    %20 = vector.load %arg10[%c1, %c8, %c0_15] : memref<18x25x4xf32, #tpu.memory_space<vmem>>, vector<16x16x4xf32>
    tpu.vector_store %arg10[%c1, %c8, %c0_15], %19 {strides = array<i32>} : memref<18x25x4xf32, #tpu.memory_space<vmem>>, vector<16x16x4xf32>,
    %c0_16 = arith.constant 0 : index
    %c0_17 = arith.constant 0 : index
    %c0_18 = arith.constant 0 : index
    %c0_19 = arith.constant 0 : index
    %21 = vector.load %arg2[%c0_16, %c0_17, %c0_18, %c0_19] : memref<1x1x16x8xf32, #tpu.memory_space<vmem>>, vector<1x1x16x8xf32>
    %22 = vector.shape_cast %21 : vector<1x1x16x8xf32> to vector<16x8xf32>
    %c0_20 = arith.constant 0 : index
    %c0_21 = arith.constant 0 : index
    %23 = vector.load %arg5[%c0_20, %c0_21] : memref<8x4xf32, #tpu.memory_space<vmem>>, vector<8x4xf32>
    %cst_22 = arith.constant dense<0.000000e+00> : vector<16x4xf32>
    %24 = tpu.matmul %22, %23, %cst_22 {dimension_numbers = #tpu.dot_dimension_numbers<[1], [0], [0], [1], [0, 0, 1, 1], [], []>} : vector<16x8xf32>, vector<8x4xf32>, vector<16x4xf32> -> vector<16x4xf32>
    %c0_23 = arith.constant 0 : index
    %c0_24 = arith.constant 0 : index
    %25 = vector.load %arg6[%c0_23, %c0_24] : memref<1x4xf32, #tpu.memory_space<vmem>>, vector<1x4xf32>
    %26 = vector.broadcast %25 : vector<1x4xf32> to vector<16x4xf32>
    %27 = arith.addf %24, %26 : vector<16x4xf32>
    %cst_25 = arith.constant 3.000000e+00 : f32
    %28 = vector.broadcast %cst_25 : f32 to vector<16x4xf32>
    %29 = arith.addf %27, %28 : vector<16x4xf32>
    %cst_26 = arith.constant 0.000000e+00 : f32
    %cst_27 = arith.constant 6.000000e+00 : f32
    %30 = vector.broadcast %cst_26 : f32 to vector<16x4xf32>
    %31 = arith.maximumf %30, %29 : vector<16x4xf32>
    %32 = vector.broadcast %cst_27 : f32 to vector<16x4xf32>
    %33 = arith.minimumf %32, %31 : vector<16x4xf32>
    %34 = arith.mulf %27, %33 : vector<16x4xf32>
    %cst_28 = arith.constant 0.166666672 : f32
    %35 = vector.broadcast %cst_28 : f32 to vector<16x4xf32>
    %36 = arith.mulf %34, %35 : vector<16x4xf32>
    %c0_i32 = arith.constant 0 : i32
    %37 = arith.cmpi sgt, %arg1, %c0_i32 : i32
    %cst_29 = arith.constant 0.000000e+00 : f32
    %38 = vector.broadcast %cst_29 : f32 to vector<16x4xf32>
    %39 = arith.select %37, %36, %38 : vector<16x4xf32>
    %c0_30 = arith.constant 0 : index
    %c8_31 = arith.constant 8 : index
    %c0_32 = arith.constant 0 : index
    %40 = vector.load %arg10[%c0_30, %c8_31, %c0_32] : memref<18x25x4xf32, #tpu.memory_space<vmem>>, vector<1x16x4xf32>
    %41 = vector.shape_cast %40 : vector<1x16x4xf32> to vector<16x4xf32>
    %42 = vector.shape_cast %39 : vector<16x4xf32> to vector<1x16x4xf32>
    tpu.vector_store %arg10[%c0_30, %c8_31, %c0_32], %42 {strides = array<i32>} : memref<18x25x4xf32, #tpu.memory_space<vmem>>, vector<1x16x4xf32>,
    %c0_33 = arith.constant 0 : index
    %c0_34 = arith.constant 0 : index
    %c0_35 = arith.constant 0 : index
    %c0_36 = arith.constant 0 : index
    %43 = vector.load %arg4[%c0_33, %c0_34, %c0_35, %c0_36] : memref<1x1x16x8xf32, #tpu.memory_space<vmem>>, vector<1x1x16x8xf32>
    %44 = vector.shape_cast %43 : vector<1x1x16x8xf32> to vector<16x8xf32>
    %c0_37 = arith.constant 0 : index
    %c0_38 = arith.constant 0 : index
    %45 = vector.load %arg5[%c0_37, %c0_38] : memref<8x4xf32, #tpu.memory_space<vmem>>, vector<8x4xf32>
    %cst_39 = arith.constant dense<0.000000e+00> : vector<16x4xf32>
    %46 = tpu.matmul %44, %45, %cst_39 {dimension_numbers = #tpu.dot_dimension_numbers<[1], [0], [0], [1], [0, 0, 1, 1], [], []>} : vector<16x8xf32>, vector<8x4xf32>, vector<16x4xf32> -> vector<16x4xf32>
    %c0_40 = arith.constant 0 : index
    %c0_41 = arith.constant 0 : index
    %47 = vector.load %arg6[%c0_40, %c0_41] : memref<1x4xf32, #tpu.memory_space<vmem>>, vector<1x4xf32>
    %48 = vector.broadcast %47 : vector<1x4xf32> to vector<16x4xf32>
    %49 = arith.addf %46, %48 : vector<16x4xf32>
    %cst_42 = arith.constant 3.000000e+00 : f32
    %50 = vector.broadcast %cst_42 : f32 to vector<16x4xf32>
    %51 = arith.addf %49, %50 : vector<16x4xf32>
    %cst_43 = arith.constant 0.000000e+00 : f32
    %cst_44 = arith.constant 6.000000e+00 : f32
    %52 = vector.broadcast %cst_43 : f32 to vector<16x4xf32>
    %53 = arith.maximumf %52, %51 : vector<16x4xf32>
    %54 = vector.broadcast %cst_44 : f32 to vector<16x4xf32>
    %55 = arith.minimumf %54, %53 : vector<16x4xf32>
    %56 = arith.mulf %49, %55 : vector<16x4xf32>
    %cst_45 = arith.constant 0.166666672 : f32
    %57 = vector.broadcast %cst_45 : f32 to vector<16x4xf32>
    %58 = arith.mulf %56, %57 : vector<16x4xf32>
    %c0_i32_46 = arith.constant 0 : i32
    %59 = arith.cmpi slt, %arg1, %c0_i32_46 : i32
    %cst_47 = arith.constant 0.000000e+00 : f32
    %60 = vector.broadcast %cst_47 : f32 to vector<16x4xf32>
    %61 = arith.select %59, %58, %60 : vector<16x4xf32>
    %c17 = arith.constant 17 : index
    %c8_48 = arith.constant 8 : index
    %c0_49 = arith.constant 0 : index
    %62 = vector.load %arg10[%c17, %c8_48, %c0_49] : memref<18x25x4xf32, #tpu.memory_space<vmem>>, vector<1x16x4xf32>
    %63 = vector.shape_cast %62 : vector<1x16x4xf32> to vector<16x4xf32>
    %64 = vector.shape_cast %61 : vector<16x4xf32> to vector<1x16x4xf32>
    tpu.vector_store %arg10[%c17, %c8_48, %c0_49], %64 {strides = array<i32>} : memref<18x25x4xf32, #tpu.memory_space<vmem>>, vector<1x16x4xf32>,
    %cst_50 = arith.constant 0.000000e+00 : f32
    %65 = vector.broadcast %cst_50 : f32 to vector<256x8xf32>
    %c0_51 = arith.constant 0 : index
    %c7 = arith.constant 7 : index
    %c0_52 = arith.constant 0 : index
    %66 = vector.load %arg10[%c0_51, %c7, %c0_52] : memref<18x25x4xf32, #tpu.memory_space<vmem>>, vector<16x16x4xf32>
    %67 = vector.shape_cast %66 : vector<16x16x4xf32> to vector<256x4xf32>
    %c0_53 = arith.constant 0 : index
    %c0_54 = arith.constant 0 : index
    %c0_55 = arith.constant 0 : index
    %68 = vector.load %arg7[%c0_53, %c0_54, %c0_55] : memref<9x4x8xf32, #tpu.memory_space<vmem>>, vector<1x4x8xf32>
    %69 = vector.shape_cast %68 : vector<1x4x8xf32> to vector<4x8xf32>
    %cst_56 = arith.constant dense<0.000000e+00> : vector<256x8xf32>
    %70 = tpu.matmul %67, %69, %cst_56 {dimension_numbers = #tpu.dot_dimension_numbers<[1], [0], [0], [1], [0, 0, 1, 1], [], []>} : vector<256x4xf32>, vector<4x8xf32>, vector<256x8xf32> -> vector<256x8xf32>
    %71 = arith.addf %65, %70 : vector<256x8xf32>
    %c0_57 = arith.constant 0 : index
    %c8_58 = arith.constant 8 : index
    %c0_59 = arith.constant 0 : index
    %72 = vector.load %arg10[%c0_57, %c8_58, %c0_59] : memref<18x25x4xf32, #tpu.memory_space<vmem>>, vector<16x16x4xf32>
    %73 = vector.shape_cast %72 : vector<16x16x4xf32> to vector<256x4xf32>
    %c1_60 = arith.constant 1 : index
    %c0_61 = arith.constant 0 : index
    %c0_62 = arith.constant 0 : index
    %74 = vector.load %arg7[%c1_60, %c0_61, %c0_62] : memref<9x4x8xf32, #tpu.memory_space<vmem>>, vector<1x4x8xf32>
    %75 = vector.shape_cast %74 : vector<1x4x8xf32> to vector<4x8xf32>
    %cst_63 = arith.constant dense<0.000000e+00> : vector<256x8xf32>
    %76 = tpu.matmul %73, %75, %cst_63 {dimension_numbers = #tpu.dot_dimension_numbers<[1], [0], [0], [1], [0, 0, 1, 1], [], []>} : vector<256x4xf32>, vector<4x8xf32>, vector<256x8xf32> -> vector<256x8xf32>
    %77 = arith.addf %71, %76 : vector<256x8xf32>
    %c0_64 = arith.constant 0 : index
    %c9 = arith.constant 9 : index
    %c0_65 = arith.constant 0 : index
    %78 = vector.load %arg10[%c0_64, %c9, %c0_65] : memref<18x25x4xf32, #tpu.memory_space<vmem>>, vector<16x16x4xf32>
    %79 = vector.shape_cast %78 : vector<16x16x4xf32> to vector<256x4xf32>
    %c2 = arith.constant 2 : index
    %c0_66 = arith.constant 0 : index
    %c0_67 = arith.constant 0 : index
    %80 = vector.load %arg7[%c2, %c0_66, %c0_67] : memref<9x4x8xf32, #tpu.memory_space<vmem>>, vector<1x4x8xf32>
    %81 = vector.shape_cast %80 : vector<1x4x8xf32> to vector<4x8xf32>
    %cst_68 = arith.constant dense<0.000000e+00> : vector<256x8xf32>
    %82 = tpu.matmul %79, %81, %cst_68 {dimension_numbers = #tpu.dot_dimension_numbers<[1], [0], [0], [1], [0, 0, 1, 1], [], []>} : vector<256x4xf32>, vector<4x8xf32>, vector<256x8xf32> -> vector<256x8xf32>
    %83 = arith.addf %77, %82 : vector<256x8xf32>
    %c1_69 = arith.constant 1 : index
    %c7_70 = arith.constant 7 : index
    %c0_71 = arith.constant 0 : index
    %84 = vector.load %arg10[%c1_69, %c7_70, %c0_71] : memref<18x25x4xf32, #tpu.memory_space<vmem>>, vector<16x16x4xf32>
    %85 = vector.shape_cast %84 : vector<16x16x4xf32> to vector<256x4xf32>
    %c3 = arith.constant 3 : index
    %c0_72 = arith.constant 0 : index
    %c0_73 = arith.constant 0 : index
    %86 = vector.load %arg7[%c3, %c0_72, %c0_73] : memref<9x4x8xf32, #tpu.memory_space<vmem>>, vector<1x4x8xf32>
    %87 = vector.shape_cast %86 : vector<1x4x8xf32> to vector<4x8xf32>
    %cst_74 = arith.constant dense<0.000000e+00> : vector<256x8xf32>
    %88 = tpu.matmul %85, %87, %cst_74 {dimension_numbers = #tpu.dot_dimension_numbers<[1], [0], [0], [1], [0, 0, 1, 1], [], []>} : vector<256x4xf32>, vector<4x8xf32>, vector<256x8xf32> -> vector<256x8xf32>
    %89 = arith.addf %83, %88 : vector<256x8xf32>
    %c1_75 = arith.constant 1 : index
    %c8_76 = arith.constant 8 : index
    %c0_77 = arith.constant 0 : index
    %90 = vector.load %arg10[%c1_75, %c8_76, %c0_77] : memref<18x25x4xf32, #tpu.memory_space<vmem>>, vector<16x16x4xf32>
    %91 = vector.shape_cast %90 : vector<16x16x4xf32> to vector<256x4xf32>
    %c4 = arith.constant 4 : index
    %c0_78 = arith.constant 0 : index
    %c0_79 = arith.constant 0 : index
    %92 = vector.load %arg7[%c4, %c0_78, %c0_79] : memref<9x4x8xf32, #tpu.memory_space<vmem>>, vector<1x4x8xf32>
    %93 = vector.shape_cast %92 : vector<1x4x8xf32> to vector<4x8xf32>
    %cst_80 = arith.constant dense<0.000000e+00> : vector<256x8xf32>
    %94 = tpu.matmul %91, %93, %cst_80 {dimension_numbers = #tpu.dot_dimension_numbers<[1], [0], [0], [1], [0, 0, 1, 1], [], []>} : vector<256x4xf32>, vector<4x8xf32>, vector<256x8xf32> -> vector<256x8xf32>
    %95 = arith.addf %89, %94 : vector<256x8xf32>
    %c1_81 = arith.constant 1 : index
    %c9_82 = arith.constant 9 : index
    %c0_83 = arith.constant 0 : index
    %96 = vector.load %arg10[%c1_81, %c9_82, %c0_83] : memref<18x25x4xf32, #tpu.memory_space<vmem>>, vector<16x16x4xf32>
    %97 = vector.shape_cast %96 : vector<16x16x4xf32> to vector<256x4xf32>
    %c5 = arith.constant 5 : index
    %c0_84 = arith.constant 0 : index
    %c0_85 = arith.constant 0 : index
    %98 = vector.load %arg7[%c5, %c0_84, %c0_85] : memref<9x4x8xf32, #tpu.memory_space<vmem>>, vector<1x4x8xf32>
    %99 = vector.shape_cast %98 : vector<1x4x8xf32> to vector<4x8xf32>
    %cst_86 = arith.constant dense<0.000000e+00> : vector<256x8xf32>
    %100 = tpu.matmul %97, %99, %cst_86 {dimension_numbers = #tpu.dot_dimension_numbers<[1], [0], [0], [1], [0, 0, 1, 1], [], []>} : vector<256x4xf32>, vector<4x8xf32>, vector<256x8xf32> -> vector<256x8xf32>
    %101 = arith.addf %95, %100 : vector<256x8xf32>
    %c2_87 = arith.constant 2 : index
    %c7_88 = arith.constant 7 : index
    %c0_89 = arith.constant 0 : index
    %102 = vector.load %arg10[%c2_87, %c7_88, %c0_89] : memref<18x25x4xf32, #tpu.memory_space<vmem>>, vector<16x16x4xf32>
    %103 = vector.shape_cast %102 : vector<16x16x4xf32> to vector<256x4xf32>
    %c6 = arith.constant 6 : index
    %c0_90 = arith.constant 0 : index
    %c0_91 = arith.constant 0 : index
    %104 = vector.load %arg7[%c6, %c0_90, %c0_91] : memref<9x4x8xf32, #tpu.memory_space<vmem>>, vector<1x4x8xf32>
    %105 = vector.shape_cast %104 : vector<1x4x8xf32> to vector<4x8xf32>
    %cst_92 = arith.constant dense<0.000000e+00> : vector<256x8xf32>
    %106 = tpu.matmul %103, %105, %cst_92 {dimension_numbers = #tpu.dot_dimension_numbers<[1], [0], [0], [1], [0, 0, 1, 1], [], []>} : vector<256x4xf32>, vector<4x8xf32>, vector<256x8xf32> -> vector<256x8xf32>
    %107 = arith.addf %101, %106 : vector<256x8xf32>
    %c2_93 = arith.constant 2 : index
    %c8_94 = arith.constant 8 : index
    %c0_95 = arith.constant 0 : index
    %108 = vector.load %arg10[%c2_93, %c8_94, %c0_95] : memref<18x25x4xf32, #tpu.memory_space<vmem>>, vector<16x16x4xf32>
    %109 = vector.shape_cast %108 : vector<16x16x4xf32> to vector<256x4xf32>
    %c7_96 = arith.constant 7 : index
    %c0_97 = arith.constant 0 : index
    %c0_98 = arith.constant 0 : index
    %110 = vector.load %arg7[%c7_96, %c0_97, %c0_98] : memref<9x4x8xf32, #tpu.memory_space<vmem>>, vector<1x4x8xf32>
    %111 = vector.shape_cast %110 : vector<1x4x8xf32> to vector<4x8xf32>
    %cst_99 = arith.constant dense<0.000000e+00> : vector<256x8xf32>
    %112 = tpu.matmul %109, %111, %cst_99 {dimension_numbers = #tpu.dot_dimension_numbers<[1], [0], [0], [1], [0, 0, 1, 1], [], []>} : vector<256x4xf32>, vector<4x8xf32>, vector<256x8xf32> -> vector<256x8xf32>
    %113 = arith.addf %107, %112 : vector<256x8xf32>
    %c2_100 = arith.constant 2 : index
    %c9_101 = arith.constant 9 : index
    %c0_102 = arith.constant 0 : index
    %114 = vector.load %arg10[%c2_100, %c9_101, %c0_102] : memref<18x25x4xf32, #tpu.memory_space<vmem>>, vector<16x16x4xf32>
    %115 = vector.shape_cast %114 : vector<16x16x4xf32> to vector<256x4xf32>
    %c8_103 = arith.constant 8 : index
    %c0_104 = arith.constant 0 : index
    %c0_105 = arith.constant 0 : index
    %116 = vector.load %arg7[%c8_103, %c0_104, %c0_105] : memref<9x4x8xf32, #tpu.memory_space<vmem>>, vector<1x4x8xf32>
    %117 = vector.shape_cast %116 : vector<1x4x8xf32> to vector<4x8xf32>
    %cst_106 = arith.constant dense<0.000000e+00> : vector<256x8xf32>
    %118 = tpu.matmul %115, %117, %cst_106 {dimension_numbers = #tpu.dot_dimension_numbers<[1], [0], [0], [1], [0, 0, 1, 1], [], []>} : vector<256x4xf32>, vector<4x8xf32>, vector<256x8xf32> -> vector<256x8xf32>
    %119 = arith.addf %113, %118 : vector<256x8xf32>
    %c0_107 = arith.constant 0 : index
    %c0_108 = arith.constant 0 : index
    %120 = vector.load %arg8[%c0_107, %c0_108] : memref<1x8xf32, #tpu.memory_space<vmem>>, vector<1x8xf32>
    %121 = vector.broadcast %120 : vector<1x8xf32> to vector<256x8xf32>
    %122 = arith.addf %119, %121 : vector<256x8xf32>
    %cst_109 = arith.constant 3.000000e+00 : f32
    %123 = vector.broadcast %cst_109 : f32 to vector<256x8xf32>
    %124 = arith.addf %122, %123 : vector<256x8xf32>
    %cst_110 = arith.constant 0.000000e+00 : f32
    %cst_111 = arith.constant 6.000000e+00 : f32
    %125 = vector.broadcast %cst_110 : f32 to vector<256x8xf32>
    %126 = arith.maximumf %125, %124 : vector<256x8xf32>
    %127 = vector.broadcast %cst_111 : f32 to vector<256x8xf32>
    %128 = arith.minimumf %127, %126 : vector<256x8xf32>
    %129 = arith.mulf %122, %128 : vector<256x8xf32>
    %cst_112 = arith.constant 0.166666672 : f32
    %130 = vector.broadcast %cst_112 : f32 to vector<256x8xf32>
    %131 = arith.mulf %129, %130 : vector<256x8xf32>
    %c0_113 = arith.constant 0 : index
    %c0_114 = arith.constant 0 : index
    %c0_115 = arith.constant 0 : index
    %c0_116 = arith.constant 0 : index
    %132 = vector.load %arg3[%c0_113, %c0_114, %c0_115, %c0_116] : memref<1x16x16x8xf32, #tpu.memory_space<vmem>>, vector<1x16x16x8xf32>
    %133 = vector.shape_cast %132 : vector<1x16x16x8xf32> to vector<16x16x8xf32>
    %134 = vector.shape_cast %133 : vector<16x16x8xf32> to vector<256x8xf32>
    %135 = arith.addf %131, %134 : vector<256x8xf32>
    %136 = vector.shape_cast %135 : vector<256x8xf32> to vector<16x16x8xf32>
    %c0_117 = arith.constant 0 : index
    %c0_118 = arith.constant 0 : index
    %c0_119 = arith.constant 0 : index
    %c0_120 = arith.constant 0 : index
    %137 = vector.load %arg9[%c0_117, %c0_118, %c0_119, %c0_120] : memref<1x16x16x8xf32, #tpu.memory_space<vmem>>, vector<1x16x16x8xf32>
    %138 = vector.shape_cast %137 : vector<1x16x16x8xf32> to vector<16x16x8xf32>
    %139 = vector.shape_cast %136 : vector<16x16x8xf32> to vector<1x16x16x8xf32>
    tpu.vector_store %arg9[%c0_117, %c0_118, %c0_119, %c0_120], %139 {strides = array<i32>} : memref<1x16x16x8xf32, #tpu.memory_space<vmem>>, vector<1x16x16x8xf32>,
    return
  }
  func.func @transform_0(%arg0: i32, %arg1: i32) -> (i32, i32, i32, i32) {
    %c16_i32 = arith.constant 16 : i32
    %0 = arith.muli %arg1, %c16_i32 : i32
    %c1_i32 = arith.constant 1 : i32
    %1 = arith.subi %0, %c1_i32 : i32
    %c0_i32 = arith.constant 0 : i32
    %2 = arith.maxsi %1, %c0_i32 : i32
    %c0_i32_0 = arith.constant 0 : i32
    %c0_i32_1 = arith.constant 0 : i32
    %c0_i32_2 = arith.constant 0 : i32
    return %arg0, %2, %c0_i32_0, %c0_i32_1 : i32, i32, i32, i32
  }
  func.func @transform_1(%arg0: i32, %arg1: i32) -> (i32, i32, i32, i32) {
    %c0_i32 = arith.constant 0 : i32
    %c0_i32_0 = arith.constant 0 : i32
    %c0_i32_1 = arith.constant 0 : i32
    return %arg0, %arg1, %c0_i32, %c0_i32_0 : i32, i32, i32, i32
  }
  func.func @transform_2(%arg0: i32, %arg1: i32) -> (i32, i32, i32, i32) {
    %c16_i32 = arith.constant 16 : i32
    %0 = arith.muli %arg1, %c16_i32 : i32
    %c16_i32_0 = arith.constant 16 : i32
    %1 = arith.addi %0, %c16_i32_0 : i32
    %c15_i32 = arith.constant 15 : i32
    %2 = arith.minsi %1, %c15_i32 : i32
    %c0_i32 = arith.constant 0 : i32
    %c0_i32_1 = arith.constant 0 : i32
    %c0_i32_2 = arith.constant 0 : i32
    return %arg0, %2, %c0_i32, %c0_i32_1 : i32, i32, i32, i32
  }
  func.func @transform_3(%arg0: i32, %arg1: i32) -> (i32, i32) {
    %c0_i32 = arith.constant 0 : i32
    %c0_i32_0 = arith.constant 0 : i32
    %c0_i32_1 = arith.constant 0 : i32
    return %c0_i32, %c0_i32_0 : i32, i32
  }
  func.func @transform_4(%arg0: i32, %arg1: i32) -> (i32, i32) {
    %c0_i32 = arith.constant 0 : i32
    %c0_i32_0 = arith.constant 0 : i32
    %c0_i32_1 = arith.constant 0 : i32
    return %c0_i32, %c0_i32_0 : i32, i32
  }
  func.func @transform_5(%arg0: i32, %arg1: i32) -> (i32, i32, i32) {
    %c0_i32 = arith.constant 0 : i32
    %c0_i32_0 = arith.constant 0 : i32
    %c0_i32_1 = arith.constant 0 : i32
    %c0_i32_2 = arith.constant 0 : i32
    return %c0_i32, %c0_i32_0, %c0_i32_1 : i32, i32, i32
  }
  func.func @transform_6(%arg0: i32, %arg1: i32) -> (i32, i32) {
    %c0_i32 = arith.constant 0 : i32
    %c0_i32_0 = arith.constant 0 : i32
    %c0_i32_1 = arith.constant 0 : i32
    return %c0_i32, %c0_i32_0 : i32, i32
  }
  func.func @transform_7(%arg0: i32, %arg1: i32) -> (i32, i32, i32, i32) {
    %c0_i32 = arith.constant 0 : i32
    %c0_i32_0 = arith.constant 0 : i32
    %c0_i32_1 = arith.constant 0 : i32
    return %arg0, %arg1, %c0_i32, %c0_i32_0 : i32, i32, i32, i32
  }
}

</mosaic_0001>

<bundles_post_ra>
// kernel: tpu_custom_call.1
= control target key start
LH: loop header
LB: loop body
LE: loop exit
PB: predicated region body
PF: predicated region fallthrough
CT: control target
= control target key end

     0   :  { %s6733_s24 = smov 0   ;;  %s6735_s25 = smov 0   ;;  %s8086_s0 = inlined_call_operand.vmem [shape: f32[2,16,16,8], index: 0, kind: input, shape index: {}]   ;;  %s8087_s1 = inlined_call_operand.vmem [shape: f32[2,16,16,8], index: 1, kind: input, shape index: {}]   ;;  %s8088_s2 = inlined_call_operand.vmem [shape: f32[2,16,16,8], index: 2, kind: input, shape index: {}]   ;;  %s8089_s3 = inlined_call_operand.vmem [shape: f32[8,4], index: 3, kind: input, shape index: {}]   ;;  %s8090_s4 = inlined_call_operand.vmem [shape: f32[1,4], index: 4, kind: input, shape index: {}]   ;;  %s8091_s5 = inlined_call_operand.vmem [shape: f32[9,4,8], index: 5, kind: input, shape index: {}]   ;;  %s8092_s6 = inlined_call_operand.vmem [shape: f32[1,8], index: 6, kind: input, shape index: {}]   ;;  %s8093_s7 = inlined_call_operand.vmem [shape: f32[2,16,16,8], index: 7, kind: output, shape index: {}]  }
   0x1   :  { %s6737_s26 = smov 0  }
   0x2 LB: > { %s29_s27 = sadd.s32 1, %s6686_s25  ;;  %p5179_p0 = scmp.ge.s32.totalorder %s6690_s26, 1  ;;  %s6690_s26 = sphi %s6737_s26, %s17_s26   ;;  %s6686_s25 = sphi %s6735_s25, %s8182_s25   ;;  %s6682_s24 = sphi %s6733_s24, %s8181_s24  }
   0x3   : > { %p31_p1 = scmp.ge.s32.totalorder %s29_s27, 2  ;;  %p323_p2 = scmp.lt.s32.totalorder %s6690_s26, 3 }
   0x5   : > { %s8184_s27 = smov (%p31_p1, %s29_s27), 0  ;;  %p324_p3 = pnand %p5179_p0, %p323_p2 }
   0x7   : > { %327 = sbr.rel (%p324_p3) target bundleno = 801 (0x321), region = 48 }
   0xe   : > { %v6756_v0 = vld [vmem:[%s8089_s3] sm:$0xff]  ;;  %p395_p4 = scmp.lt.s32.totalorder %s6682_s24, 1  ;;  %vm447_vm0 = vcmask 31744   ;;  %v6692_v1 = vmov 0.0   ;;  %vm561_vm1 = vcmask 64512   ;;  %vm451_vm2 = vcmask 24576  }
   0xf   : > { %5877 = vmatprep.subr.mxu0 %v6756_v0  ;;  %455 = vst.msk [vmem:[#allocation2 + $0x30] sm:$0xff] %vm447_vm0, %v6692_v1  ;;  %448 = vst.msk [vmem:[#allocation2] sm:$0xff] %vm447_vm0, %v6692_v1  ;;  %5932 = vmatprep.subr.mxu1 %v6756_v0  ;;  %v5227_v37 = vld [vmem:[%s8091_s5 + $0x4] sm:$0xf]  ;;  %vm1458_vm3 = vcmask 1043456  }
  0x10   : > { %449 = vst.msk [vmem:[#allocation2 + $0x8] sm:$0xff] %vm447_vm0, %v6692_v1  ;;  %450 = vst.msk [vmem:[#allocation2 + $0x10] sm:$0xff] %vm447_vm0, %v6692_v1  ;;  %5878 = vmatpush3.msra.mxu0 %v6756_v0  ;;  %s8186_s24 = smov (!%p395_p4, %s6682_s24), 1  ;;  %5933 = vmatpush3.msra.mxu1 %v6756_v0  ;;  %v5362_v41 = vld [vmem:[%s8091_s5 + $0x10] sm:$0xf] }
  0x11   : > { %453 = vst.msk [vmem:[#allocation2 + $0x20] sm:$0xff] %vm447_vm0, %v6692_v1  ;;  %454 = vst.msk [vmem:[#allocation2 + $0x28] sm:$0xff] %vm447_vm0, %v6692_v1  ;;  %5927 = vmatprep.subr.mxu0 %v6756_v0  ;;  %s6883_s30 = sshll.u32 %s8186_s24, 8  ;;  %6137 = vmatprep.subr.msk.mxu1 %vm1458_vm3, %v5362_v41  ;;  %v7019_v42 = vld [vmem:[%s8091_s5 + $0x14] sm:$0xf] }
  0x12   : > { %457 = vst.msk [vmem:[#allocation2 + $0x40] sm:$0xff] %vm447_vm0, %v6692_v1  ;;  %458 = vst.msk [vmem:[#allocation2 + $0x48] sm:$0xff] %vm447_vm0, %v6692_v1  ;;  %s6889_s10 = scalar_lea.vmem %s8087_s1, %s6883_s30  ;;  %s403_s13 = scalar_lea.vmem %s8086_s0, %s6883_s30  ;;  %v1327_v43 = vld [vmem:[%s8091_s5] sm:$0xf] }
  0x13   : > { %459 = vst.msk [vmem:[#allocation2 + $0x50] sm:$0xff] %vm447_vm0, %v6692_v1  ;;  %461 = vst.msk [vmem:[#allocation2 + $0x60] sm:$0xff] %vm447_vm0, %v6692_v1  ;;  %v521_v2 = vld [vmem:[%s6889_s10] sm:$0xff]  ;;  %v522_v3 = vld [vmem:[%s6889_s10 + $0x8] sm:$0xff]  ;;  %s5538_s14 = sadd.s32 240, %s6883_s30  ;;  %s7930_s24 = scalar_lea.vmem %s8093_s7, %s6883_s30 }
  0x14   : > { %462 = vst.msk [vmem:[#allocation2 + $0x68] sm:$0xff] %vm447_vm0, %v6692_v1  ;;  %463 = vst.msk [vmem:[#allocation2 + $0x70] sm:$0xff] %vm447_vm0, %v6692_v1  ;;  %v523_v4 = vld [vmem:[%s6889_s10 + $0x10] sm:$0xff]  ;;  %5879 = vmatprep.mubr.msk.f32.mxu0 %vm561_vm1, %v521_v2  ;;  %v524_v5 = vld [vmem:[%s6889_s10 + $0x18] sm:$0xff]  ;;  %s431_s17 = scalar_lea.vmem %s8088_s2, %s5538_s14 }
  0x15   : > { %465 = vst.msk [vmem:[#allocation2 + $0x80] sm:$0xff] %vm447_vm0, %v6692_v1  ;;  %466 = vst.msk [vmem:[#allocation2 + $0x88] sm:$0xff] %vm447_vm0, %v6692_v1  ;;  %5880 = vmatmul.mubr.msk.f32.vlgmr.msra.gmra.mrb[0].mxu0 %vm561_vm1, %v522_v3  ;;  %v525_v6 = vld [vmem:[%s6889_s10 + $0x20] sm:$0xff]  ;;  %v526_v7 = vld [vmem:[%s6889_s10 + $0x28] sm:$0xff] }
  0x16   : > { %467 = vst.msk [vmem:[#allocation2 + $0x90] sm:$0xff] %vm447_vm0, %v6692_v1  ;;  %469 = vst.msk [vmem:[#allocation2 + $0xa0] sm:$0xff] %vm447_vm0, %v6692_v1  ;;  %5882 = vmatprep.mubr.msk.f32.mxu0 %vm561_vm1, %v523_v4  ;;  %5928 = vmatpush3.msra.mxu0 %v6756_v0  ;;  %v527_v8 = vld [vmem:[%s6889_s10 + $0x30] sm:$0xff]  ;;  %v528_v9 = vld [vmem:[%s6889_s10 + $0x38] sm:$0xff] }
  0x17   : > { %470 = vst.msk [vmem:[#allocation2 + $0xa8] sm:$0xff] %vm447_vm0, %v6692_v1  ;;  %471 = vst.msk [vmem:[#allocation2 + $0xb0] sm:$0xff] %vm447_vm0, %v6692_v1  ;;  %v529_v10 = vld [vmem:[%s6889_s10 + $0x40] sm:$0xff]  ;;  %v530_v11 = vld [vmem:[%s6889_s10 + $0x48] sm:$0xff]  ;;  %5937 = vmatprep.subr.msk.mxu0 %vm1458_vm3, %v5227_v37 }
  0x18   : > { %473 = vst.msk [vmem:[#allocation2 + $0xc0] sm:$0xff] %vm447_vm0, %v6692_v1  ;;  %474 = vst.msk [vmem:[#allocation2 + $0xc8] sm:$0xff] %vm447_vm0, %v6692_v1  ;;  %v531_v12 = vld [vmem:[%s6889_s10 + $0x50] sm:$0xff]  ;;  %v532_v13 = vld [vmem:[%s6889_s10 + $0x58] sm:$0xff] }
  0x19   : > { %475 = vst.msk [vmem:[#allocation2 + $0xd0] sm:$0xff] %vm447_vm0, %v6692_v1  ;;  %477 = vst.msk [vmem:[#allocation2 + $0xe0] sm:$0xff] %vm447_vm0, %v6692_v1  ;;  %5883 = vmatmul.mubr.msk.f32.gmra.mrb[2].mxu0 %vm561_vm1, %v524_v5  ;;  %v533_v14 = vld [vmem:[%s6889_s10 + $0x60] sm:$0xff]  ;;  %v534_v15 = vld [vmem:[%s6889_s10 + $0x68] sm:$0xff] }
  0x1a   : > { %478 = vst.msk [vmem:[#allocation2 + $0xe8] sm:$0xff] %vm447_vm0, %v6692_v1  ;;  %479 = vst.msk [vmem:[#allocation2 + $0xf0] sm:$0xff] %vm447_vm0, %v6692_v1  ;;  %5885 = vmatprep.mubr.msk.f32.mxu0 %vm561_vm1, %v525_v6  ;;  %v535_v16 = vld [vmem:[%s6889_s10 + $0x70] sm:$0xff]  ;;  %v536_v17 = vld [vmem:[%s6889_s10 + $0x78] sm:$0xff] }
  0x1b   : > { %481 = vst.msk [vmem:[#allocation2 + $0x100] sm:$0xff] %vm447_vm0, %v6692_v1  ;;  %482 = vst.msk [vmem:[#allocation2 + $0x108] sm:$0xff] %vm447_vm0, %v6692_v1  ;;  %v537_v18 = vld [vmem:[%s6889_s10 + $0x80] sm:$0xff]  ;;  %v538_v19 = vld [vmem:[%s6889_s10 + $0x88] sm:$0xff] }
  0x1c   : > { %483 = vst.msk [vmem:[#allocation2 + $0x110] sm:$0xff] %vm447_vm0, %v6692_v1  ;;  %485 = vst.msk [vmem:[#allocation2 + $0x120] sm:$0xff] %vm447_vm0, %v6692_v1  ;;  %v539_v20 = vld [vmem:[%s6889_s10 + $0x90] sm:$0xff]  ;;  %v540_v21 = vld [vmem:[%s6889_s10 + $0x98] sm:$0xff] }
  0x1d   : > { %486 = vst.msk [vmem:[#allocation2 + $0x128] sm:$0xff] %vm447_vm0, %v6692_v1  ;;  %487 = vst.msk [vmem:[#allocation2 + $0x130] sm:$0xff] %vm447_vm0, %v6692_v1  ;;  %5886 = vmatmul.mubr.msk.f32.gmra.mrb[4].mxu0 %vm561_vm1, %v526_v7  ;;  %v541_v22 = vld [vmem:[%s6889_s10 + $0xa0] sm:$0xff]  ;;  %v542_v23 = vld [vmem:[%s6889_s10 + $0xa8] sm:$0xff] }
  0x1e   : > { %489 = vst.msk [vmem:[#allocation2 + $0x140] sm:$0xff] %vm447_vm0, %v6692_v1  ;;  %490 = vst.msk [vmem:[#allocation2 + $0x148] sm:$0xff] %vm447_vm0, %v6692_v1  ;;  %5888 = vmatprep.mubr.msk.f32.mxu0 %vm561_vm1, %v527_v8  ;;  %v543_v24 = vld [vmem:[%s6889_s10 + $0xb0] sm:$0xff]  ;;  %v544_v25 = vld [vmem:[%s6889_s10 + $0xb8] sm:$0xff] }
  0x1f   : > { %491 = vst.msk [vmem:[#allocation2 + $0x150] sm:$0xff] %vm447_vm0, %v6692_v1  ;;  %493 = vst.msk [vmem:[#allocation2 + $0x160] sm:$0xff] %vm447_vm0, %v6692_v1  ;;  %v545_v26 = vld [vmem:[%s6889_s10 + $0xc0] sm:$0xff]  ;;  %v546_v27 = vld [vmem:[%s6889_s10 + $0xc8] sm:$0xff] }
  0x20   : > { %494 = vst.msk [vmem:[#allocation2 + $0x168] sm:$0xff] %vm447_vm0, %v6692_v1  ;;  %495 = vst.msk [vmem:[#allocation2 + $0x170] sm:$0xff] %vm447_vm0, %v6692_v1  ;;  %v547_v28 = vld [vmem:[%s6889_s10 + $0xd0] sm:$0xff]  ;;  %v548_v29 = vld [vmem:[%s6889_s10 + $0xd8] sm:$0xff] }
  0x21   : > { %497 = vst.msk [vmem:[#allocation2 + $0x180] sm:$0xff] %vm447_vm0, %v6692_v1  ;;  %498 = vst.msk [vmem:[#allocation2 + $0x188] sm:$0xff] %vm447_vm0, %v6692_v1  ;;  %5889 = vmatmul.mubr.msk.f32.gmra.mrb[6].mxu0 %vm561_vm1, %v528_v9  ;;  %v549_v30 = vld [vmem:[%s6889_s10 + $0xe0] sm:$0xff]  ;;  %v550_v31 = vld [vmem:[%s6889_s10 + $0xe8] sm:$0xff] }
  0x22   : > { %499 = vst.msk [vmem:[#allocation2 + $0x190] sm:$0xff] %vm447_vm0, %v6692_v1  ;;  %501 = vst.msk [vmem:[#allocation2 + $0x1a0] sm:$0xff] %vm447_vm0, %v6692_v1  ;;  %5891 = vmatprep.mubr.msk.f32.mxu0 %vm561_vm1, %v529_v10  ;;  %v551_v32 = vld [vmem:[%s6889_s10 + $0xf0] sm:$0xff]  ;;  %v552_v33 = vld [vmem:[%s6889_s10 + $0xf8] sm:$0xff] }
  0x23   : > { %502 = vst.msk [vmem:[#allocation2 + $0x1a8] sm:$0xff] %vm447_vm0, %v6692_v1  ;;  %503 = vst.msk [vmem:[#allocation2 + $0x1b0] sm:$0xff] %vm447_vm0, %v6692_v1  ;;  %v1076_v34 = vld [vmem:[%s403_s13] sm:$0xff]  ;;  %v1077_v35 = vld [vmem:[%s403_s13 + $0x8] sm:$0xff] }
  0x24   : > { %505 = vst.msk [vmem:[#allocation2 + $0x1c0] sm:$0xff] %vm447_vm0, %v6692_v1  ;;  %506 = vst.msk [vmem:[#allocation2 + $0x1c8] sm:$0xff] %vm447_vm0, %v6692_v1  ;;  %v1185_v36 = vld [vmem:[%s431_s17] sm:$0xff]  ;;  %v1186_v38 = vld [vmem:[%s431_s17 + $0x8] sm:$0xff] }
  0x25   : > { %507 = vst.msk [vmem:[#allocation2 + $0x1d0] sm:$0xff] %vm447_vm0, %v6692_v1  ;;  %509 = vst.msk [vmem:[#allocation2 + $0x1e0] sm:$0xff] %vm447_vm0, %v6692_v1  ;;  %5892 = vmatmul.mubr.msk.f32.gmra.mrb[8].mxu0 %vm561_vm1, %v530_v11  ;;  %5934 = vmatprep.mubr.msk.f32.mxu1 %vm561_vm1, %v1185_v36  ;;  %v7031_v44 = vld [vmem:[%s8090_s4] ss:$0 sm:$0xff] }
  0x26   : > { %510 = vst.msk [vmem:[#allocation2 + $0x1e8] sm:$0xff] %vm447_vm0, %v6692_v1  ;;  %511 = vst.msk [vmem:[#allocation2 + $0x1f0] sm:$0xff] %vm447_vm0, %v6692_v1  ;;  %5894 = vmatprep.mubr.msk.f32.mxu0 %vm561_vm1, %v531_v12  ;;  %5935 = vmatmul.mubr.msk.f32.vlgmr.msra.gmra.mrb[0].mxu1 %vm561_vm1, %v1186_v38 }
  0x27   : > { %513 = vst.msk [vmem:[#allocation2 + $0x200] sm:$0xff] %vm447_vm0, %v6692_v1  ;;  %514 = vst.msk [vmem:[#allocation2 + $0x208] sm:$0xff] %vm447_vm0, %v6692_v1  ;;  %6138 = vmatpush3.msk.msra.mxu1 %vm1458_vm3, %v5362_v41 }
  0x28   : > { %515 = vst.msk [vmem:[#allocation2 + $0x210] sm:$0xff] %vm447_vm0, %v6692_v1  ;;  %517 = vst.msk [vmem:[#allocation2 + $0x220] sm:$0xff] %vm447_vm0, %v6692_v1  ;;  %6187 = vmatprep.subr.msk.mxu1 %vm1458_vm3, %v7019_v42 }
  0x29   : > { %518 = vst.msk [vmem:[#allocation2 + $0x228] sm:$0xff] %vm447_vm0, %v6692_v1  ;;  %519 = vst.msk [vmem:[#allocation2 + $0x230] sm:$0xff] %vm447_vm0, %v6692_v1  ;;  %5895 = vmatmul.mubr.msk.f32.gmra.mrb[10].mxu0 %vm561_vm1, %v532_v13 }
  0x2a   : > { %1183 = vst.msk [vmem:[#allocation2 + $0x8] sm:$0xff] %vm447_vm0, %v6692_v1  ;;  %1184 = vst.msk [vmem:[#allocation2 + $0x10] sm:$0xff] %vm447_vm0, %v6692_v1  ;;  %5897 = vmatprep.mubr.msk.f32.mxu0 %vm561_vm1, %v533_v14 }
  0x2b   : > { %1293 = vst.msk [vmem:[#allocation2 + $0x228] sm:$0xff] %vm447_vm0, %v6692_v1  ;;  %1294 = vst.msk [vmem:[#allocation2 + $0x230] sm:$0xff] %vm447_vm0, %v6692_v1 }
  0x2c   : > { %456 = vst.msk [vmem:[#allocation2 + $0x38] sm:$0x1] %vm451_vm2, %v6692_v1  ;;  %452 = vst.msk [vmem:[#allocation2 + $0x18] sm:$0x1] %vm451_vm2, %v6692_v1 }
  0x2d   : > { %5898 = vmatmul.mubr.msk.f32.gmra.mrb[12].mxu0 %vm561_vm1, %v534_v15  ;;  %460 = vst.msk [vmem:[#allocation2 + $0x58] sm:$0x1] %vm451_vm2, %v6692_v1  ;;  %464 = vst.msk [vmem:[#allocation2 + $0x78] sm:$0x1] %vm451_vm2, %v6692_v1 }
  0x2e   : > { %5900 = vmatprep.mubr.msk.f32.mxu0 %vm561_vm1, %v535_v16  ;;  %468 = vst.msk [vmem:[#allocation2 + $0x98] sm:$0x1] %vm451_vm2, %v6692_v1  ;;  %472 = vst.msk [vmem:[#allocation2 + $0xb8] sm:$0x1] %vm451_vm2, %v6692_v1 }
  0x2f   : > { %476 = vst.msk [vmem:[#allocation2 + $0xd8] sm:$0x1] %vm451_vm2, %v6692_v1  ;;  %480 = vst.msk [vmem:[#allocation2 + $0xf8] sm:$0x1] %vm451_vm2, %v6692_v1 }
  0x30   : > { %484 = vst.msk [vmem:[#allocation2 + $0x118] sm:$0x1] %vm451_vm2, %v6692_v1  ;;  %488 = vst.msk [vmem:[#allocation2 + $0x138] sm:$0x1] %vm451_vm2, %v6692_v1 }
  0x31   : > { %5901 = vmatmul.mubr.msk.f32.gmra.mrb[14].mxu0 %vm561_vm1, %v536_v17  ;;  %492 = vst.msk [vmem:[#allocation2 + $0x158] sm:$0x1] %vm451_vm2, %v6692_v1  ;;  %496 = vst.msk [vmem:[#allocation2 + $0x178] sm:$0x1] %vm451_vm2, %v6692_v1  ;;  %v1328_v39 = vld [vmem:[#allocation2 + $0x8] sm:$0xff]  ;;  %v1329_v40 = vld [vmem:[#allocation2 + $0x10] sm:$0xff] }
  0x32   : > { %5903 = vmatprep.mubr.msk.f32.mxu0 %vm561_vm1, %v537_v18  ;;  %500 = vst.msk [vmem:[#allocation2 + $0x198] sm:$0x1] %vm451_vm2, %v6692_v1  ;;  %504 = vst.msk [vmem:[#allocation2 + $0x1b8] sm:$0x1] %vm451_vm2, %v6692_v1 }
  0x33   : > { %508 = vst.msk [vmem:[#allocation2 + $0x1d8] sm:$0x1] %vm451_vm2, %v6692_v1  ;;  %512 = vst.msk [vmem:[#allocation2 + $0x1f8] sm:$0x1] %vm451_vm2, %v6692_v1 }
  0x34   : > { %516 = vst.msk [vmem:[#allocation2 + $0x218] sm:$0x1] %vm451_vm2, %v6692_v1  ;;  %520 = vst.msk [vmem:[#allocation2 + $0x238] sm:$0x1] %vm451_vm2, %v6692_v1 }
  0x35   : > { %5904 = vmatmul.mubr.msk.f32.gmra.mrb[16].mxu0 %vm561_vm1, %v538_v19 }
  0x36   : > { %5906 = vmatprep.mubr.msk.f32.mxu0 %vm561_vm1, %v539_v20 }
  0x39   : > { %5907 = vmatmul.mubr.msk.f32.gmra.mrb[18].mxu0 %vm561_vm1, %v540_v21 }
  0x3a   : > { %5909 = vmatprep.mubr.msk.f32.mxu0 %vm561_vm1, %v541_v22 }
  0x3d   : > { %5910 = vmatmul.mubr.msk.f32.gmra.mrb[20].mxu0 %vm561_vm1, %v542_v23 }
  0x3e   : > { %5912 = vmatprep.mubr.msk.f32.mxu0 %vm561_vm1, %v543_v24 }
  0x41   : > { %5913 = vmatmul.mubr.msk.f32.gmra.mrb[22].mxu0 %vm561_vm1, %v544_v25 }
  0x42   : > { %5915 = vmatprep.mubr.msk.f32.mxu0 %vm561_vm1, %v545_v26 }
  0x45   : > { %5916 = vmatmul.mubr.msk.f32.gmra.mrb[24].mxu0 %vm561_vm1, %v546_v27 }
  0x46   : > { %5918 = vmatprep.mubr.msk.f32.mxu0 %vm561_vm1, %v547_v28 }
  0x49   : > { %5919 = vmatmul.mubr.msk.f32.gmra.mrb[26].mxu0 %vm561_vm1, %v548_v29 }
  0x4a   : > { %5921 = vmatprep.mubr.msk.f32.mxu0 %vm561_vm1, %v549_v30  ;;  %v7048_v30 = vld [vmem:[%s8091_s5 + $0x8] sm:$0xf] }
  0x4d   : > { %5922 = vmatmul.mubr.msk.f32.gmra.mrb[28].mxu0 %vm561_vm1, %v550_v31 }
  0x4e   : > { %5924 = vmatprep.mubr.msk.f32.mxu0 %vm561_vm1, %v551_v32 }
  0x51   : > { %5925 = vmatmul.mubr.msk.f32.gmra.mrb[30].mxu0 %vm561_vm1, %v552_v33 }
  0x52   : > { %5929 = vmatprep.mubr.msk.f32.mxu0 %vm561_vm1, %v1076_v34 }
  0x55   : > { %5930 = vmatmul.mubr.msk.f32.vlgmr.msra.gmra.mrb[32].mxu0 %vm561_vm1, %v1077_v35 }
  0x56   : > { %5938 = vmatpush3.msk.msra.mxu0 %vm1458_vm3, %v5227_v37  ;;  %5939 = vmatprep.mubr.msk.f32.mxu0 %vm447_vm0, %v1328_v39 }
  0x57   : > { %5987 = vmatprep.subr.msk.mxu0 %vm1458_vm3, %v1327_v43 }
  0x59   : > { %5940 = vmatmul.mubr.msk.f32.vlgmr.msra.gmra.mrb[34].mxu0 %vm447_vm0, %v1329_v40 }
  0x5a   : > { %5988 = vmatpush3.msk.msra.mxu0 %vm1458_vm3, %v1327_v43 }
  0x5b   : > { %6037 = vmatprep.subr.msk.mxu0 %vm1458_vm3, %v7048_v30 }
  0xe8   : > { %v5881_v45 = vpop.f32.mrb[0].mxu0 }
  0xe9   : > { %v730_v46 = vadd.f32 %v5881_v45, %v7031_v44  ;;  %v724_v47 = vpop.f32.mrb[1].mxu0 }
  0xea   : > { %v725_v48 = vadd.f32 %v7031_v44, %v724_v47 }
  0xeb   : > { %v884_v49 = vadd.f32 3.0, %v730_v46 }
  0xec   : > { %v883_v50 = vadd.f32 3.0, %v725_v48  ;;  %v5884_v51 = vpop.f32.mrb[2].mxu0 }
  0xed   : > { %v916_v52 = vmax.f32 %v884_v49, 0.0  ;;  %v740_v53 = vadd.f32 %v5884_v51, %v7031_v44  ;;  %v734_v54 = vpop.f32.mrb[3].mxu0 }
  0xee   : > { %v915_v55 = vmax.f32 %v883_v50, 0.0  ;;  %v735_v56 = vadd.f32 %v7031_v44, %v734_v54 }
  0xef   : > { %v948_v57 = vmin.f32 %v916_v52, 6.0  ;;  %v886_v58 = vadd.f32 3.0, %v740_v53  ;;  %v7063_v52 = vld [vmem:[%s8091_s5 + $0x18] sm:$0xf] }
  0xf0   : > { %v947_v59 = vmin.f32 %v915_v55, 6.0  ;;  %v885_v60 = vadd.f32 3.0, %v735_v56  ;;  %v5887_v61 = vpop.f32.mrb[4].mxu0 }
  0xf1   : > { %v980_v62 = vmul.f32 %v948_v57, %v730_v46  ;;  %v918_v63 = vmax.f32 %v886_v58, 0.0  ;;  %v750_v0 = vadd.f32 %v5887_v61, %v7031_v44  ;;  %v744_v1 = vpop.f32.mrb[5].mxu0 }
  0xf2   : > { %v979_v2 = vmul.f32 %v947_v59, %v725_v48  ;;  %v917_v3 = vmax.f32 %v885_v60, 0.0  ;;  %v745_v4 = vadd.f32 %v7031_v44, %v744_v1 }
  0xf3   : > { %v1012_v5 = vmul.f32 0.16666667, %v980_v62  ;;  %v950_v6 = vmin.f32 %v918_v63, 6.0  ;;  %v888_v7 = vadd.f32 3.0, %v750_v0 }
  0xf4   : > { %v1011_v8 = vmul.f32 0.16666667, %v979_v2  ;;  %v949_v9 = vmin.f32 %v917_v3, 6.0  ;;  %v887_v10 = vadd.f32 3.0, %v745_v4  ;;  %v5890_v11 = vpop.f32.mrb[6].mxu0 }
  0xf5   : > { %1045 = vst.msk [vmem:[#allocation2 + $0x30] sm:$0xff] %vm447_vm0, %v1012_v5  ;;  %v982_v12 = vmul.f32 %v950_v6, %v740_v53  ;;  %v920_v13 = vmax.f32 %v888_v7, 0.0  ;;  %v760_v14 = vadd.f32 %v5890_v11, %v7031_v44  ;;  %v754_v15 = vpop.f32.mrb[7].mxu0 }
  0xf6   : > { %1044 = vst.msk [vmem:[#allocation2 + $0x28] sm:$0xff] %vm447_vm0, %v1011_v8  ;;  %v981_v16 = vmul.f32 %v949_v9, %v735_v56  ;;  %v919_v17 = vmax.f32 %v887_v10, 0.0  ;;  %v755_v18 = vadd.f32 %v7031_v44, %v754_v15 }
  0xf7   : > { %v1014_v19 = vmul.f32 0.16666667, %v982_v12  ;;  %v952_v20 = vmin.f32 %v920_v13, 6.0  ;;  %v890_v21 = vadd.f32 3.0, %v760_v14 }
  0xf8   : > { %v1013_v22 = vmul.f32 0.16666667, %v981_v16  ;;  %v951_v23 = vmin.f32 %v919_v17, 6.0  ;;  %v889_v24 = vadd.f32 3.0, %v755_v18  ;;  %v5893_v25 = vpop.f32.mrb[8].mxu0 }
  0xf9   : > { %1047 = vst.msk [vmem:[#allocation2 + $0x50] sm:$0xff] %vm447_vm0, %v1014_v19  ;;  %v984_v26 = vmul.f32 %v952_v20, %v750_v0  ;;  %v922_v27 = vmax.f32 %v890_v21, 0.0  ;;  %v770_v28 = vadd.f32 %v5893_v25, %v7031_v44  ;;  %v764_v29 = vpop.f32.mrb[9].mxu0 }
  0xfa   : > { %1046 = vst.msk [vmem:[#allocation2 + $0x48] sm:$0xff] %vm447_vm0, %v1013_v22  ;;  %v983_v31 = vmul.f32 %v951_v23, %v745_v4  ;;  %v921_v32 = vmax.f32 %v889_v24, 0.0  ;;  %v765_v33 = vadd.f32 %v7031_v44, %v764_v29 }
  0xfb   : > { %v1016_v34 = vmul.f32 0.16666667, %v984_v26  ;;  %v954_v35 = vmin.f32 %v922_v27, 6.0  ;;  %v892_v36 = vadd.f32 3.0, %v770_v28 }
  0xfc   : > { %v1015_v37 = vmul.f32 0.16666667, %v983_v31  ;;  %v953_v38 = vmin.f32 %v921_v32, 6.0  ;;  %v891_v39 = vadd.f32 3.0, %v765_v33  ;;  %v5896_v40 = vpop.f32.mrb[10].mxu0  ;;  %v1331_v51 = vld [vmem:[#allocation2 + $0x30] sm:$0xff] }
  0xfd   : > { %1049 = vst.msk [vmem:[#allocation2 + $0x70] sm:$0xff] %vm447_vm0, %v1016_v34  ;;  %v986_v41 = vmul.f32 %v954_v35, %v760_v14  ;;  %v924_v43 = vmax.f32 %v892_v36, 0.0  ;;  %v780_v45 = vadd.f32 %v5896_v40, %v7031_v44  ;;  %v774_v46 = vpop.f32.mrb[11].mxu0  ;;  %v1330_v47 = vld [vmem:[#allocation2 + $0x28] sm:$0xff] }
  0xfe   : > { %1048 = vst.msk [vmem:[#allocation2 + $0x68] sm:$0xff] %vm447_vm0, %v1015_v37  ;;  %v985_v48 = vmul.f32 %v953_v38, %v755_v18  ;;  %v923_v49 = vmax.f32 %v891_v39, 0.0  ;;  %v775_v50 = vadd.f32 %v7031_v44, %v774_v46  ;;  %5942 = vmatprep.mubr.msk.f32.mxu0 %vm447_vm0, %v1330_v47  ;;  %6139 = vmatprep.mubr.msk.f32.mxu1 %vm447_vm0, %v1330_v47 }
  0xff   : > { %v1018_v53 = vmul.f32 0.16666667, %v986_v41  ;;  %v956_v54 = vmin.f32 %v924_v43, 6.0  ;;  %v894_v55 = vadd.f32 3.0, %v780_v45  ;;  %5943 = vmatmul.mubr.msk.f32.gmra.mrb[36].mxu0 %vm447_vm0, %v1331_v51  ;;  %6140 = vmatmul.mubr.msk.f32.vlgmr.msra.gmra.mrb[2].mxu1 %vm447_vm0, %v1331_v51 }
 0x100   : > { %v1017_v56 = vmul.f32 0.16666667, %v985_v48  ;;  %v955_v57 = vmin.f32 %v923_v49, 6.0  ;;  %v893_v58 = vadd.f32 3.0, %v775_v50  ;;  %6188 = vmatpush3.msk.msra.mxu1 %vm1458_vm3, %v7019_v42  ;;  %v5899_v59 = vpop.f32.mrb[12].mxu0  ;;  %v1333_v42 = vld [vmem:[#allocation2 + $0x50] sm:$0xff] }
 0x101   : > { %1051 = vst.msk [vmem:[#allocation2 + $0x90] sm:$0xff] %vm447_vm0, %v1018_v53  ;;  %v988_v60 = vmul.f32 %v956_v54, %v770_v28  ;;  %v926_v61 = vmax.f32 %v894_v55, 0.0  ;;  %v790_v62 = vadd.f32 %v5899_v59, %v7031_v44  ;;  %v784_v63 = vpop.f32.mrb[13].mxu0  ;;  %v1332_v0 = vld [vmem:[#allocation2 + $0x48] sm:$0xff]  ;;  %6237 = vmatprep.subr.msk.mxu1 %vm1458_vm3, %v7063_v52 }
 0x102   : > { %1050 = vst.msk [vmem:[#allocation2 + $0x88] sm:$0xff] %vm447_vm0, %v1017_v56  ;;  %v987_v1 = vmul.f32 %v955_v57, %v765_v33  ;;  %v925_v2 = vmax.f32 %v893_v58, 0.0  ;;  %v785_v3 = vadd.f32 %v7031_v44, %v784_v63  ;;  %5945 = vmatprep.mubr.msk.f32.mxu0 %vm447_vm0, %v1332_v0  ;;  %6142 = vmatprep.mubr.msk.f32.mxu1 %vm447_vm0, %v1332_v0 }
 0x103   : > { %v1020_v4 = vmul.f32 0.16666667, %v988_v60  ;;  %v958_v5 = vmin.f32 %v926_v61, 6.0  ;;  %v896_v6 = vadd.f32 3.0, %v790_v62  ;;  %5946 = vmatmul.mubr.msk.f32.gmra.mrb[38].mxu0 %vm447_vm0, %v1333_v42  ;;  %6143 = vmatmul.mubr.msk.f32.gmra.mrb[4].mxu1 %vm447_vm0, %v1333_v42 }
 0x104   : > { %v1019_v7 = vmul.f32 0.16666667, %v987_v1  ;;  %v957_v8 = vmin.f32 %v925_v2, 6.0  ;;  %v895_v9 = vadd.f32 3.0, %v785_v3  ;;  %v5902_v10 = vpop.f32.mrb[14].mxu0  ;;  %v1335_v19 = vld [vmem:[#allocation2 + $0x70] sm:$0xff] }
 0x105   : > { %1053 = vst.msk [vmem:[#allocation2 + $0xb0] sm:$0xff] %vm447_vm0, %v1020_v4  ;;  %v990_v11 = vmul.f32 %v958_v5, %v780_v45  ;;  %v928_v12 = vmax.f32 %v896_v6, 0.0  ;;  %v800_v13 = vadd.f32 %v5902_v10, %v7031_v44  ;;  %v794_v14 = vpop.f32.mrb[15].mxu0  ;;  %v1334_v15 = vld [vmem:[#allocation2 + $0x68] sm:$0xff] }
 0x106   : > { %1052 = vst.msk [vmem:[#allocation2 + $0xa8] sm:$0xff] %vm447_vm0, %v1019_v7  ;;  %v989_v16 = vmul.f32 %v957_v8, %v775_v50  ;;  %v927_v17 = vmax.f32 %v895_v9, 0.0  ;;  %v795_v18 = vadd.f32 %v7031_v44, %v794_v14  ;;  %5948 = vmatprep.mubr.msk.f32.mxu0 %vm447_vm0, %v1334_v15  ;;  %6145 = vmatprep.mubr.msk.f32.mxu1 %vm447_vm0, %v1334_v15 }
 0x107   : > { %v1022_v20 = vmul.f32 0.16666667, %v990_v11  ;;  %v960_v21 = vmin.f32 %v928_v12, 6.0  ;;  %v898_v22 = vadd.f32 3.0, %v800_v13  ;;  %5949 = vmatmul.mubr.msk.f32.gmra.mrb[40].mxu0 %vm447_vm0, %v1335_v19  ;;  %6146 = vmatmul.mubr.msk.f32.gmra.mrb[6].mxu1 %vm447_vm0, %v1335_v19 }
 0x108   : > { %v1021_v23 = vmul.f32 0.16666667, %v989_v16  ;;  %v959_v24 = vmin.f32 %v927_v17, 6.0  ;;  %v897_v25 = vadd.f32 3.0, %v795_v18  ;;  %v5905_v26 = vpop.f32.mrb[16].mxu0  ;;  %v1337_v36 = vld [vmem:[#allocation2 + $0x90] sm:$0xff] }
 0x109   : > { %1055 = vst.msk [vmem:[#allocation2 + $0xd0] sm:$0xff] %vm447_vm0, %v1022_v20  ;;  %v992_v27 = vmul.f32 %v960_v21, %v790_v62  ;;  %v930_v28 = vmax.f32 %v898_v22, 0.0  ;;  %v810_v29 = vadd.f32 %v5905_v26, %v7031_v44  ;;  %v804_v31 = vpop.f32.mrb[17].mxu0  ;;  %v1336_v32 = vld [vmem:[#allocation2 + $0x88] sm:$0xff] }
 0x10a   : > { %1054 = vst.msk [vmem:[#allocation2 + $0xc8] sm:$0xff] %vm447_vm0, %v1021_v23  ;;  %v991_v33 = vmul.f32 %v959_v24, %v785_v3  ;;  %v929_v34 = vmax.f32 %v897_v25, 0.0  ;;  %v805_v35 = vadd.f32 %v7031_v44, %v804_v31  ;;  %5951 = vmatprep.mubr.msk.f32.mxu0 %vm447_vm0, %v1336_v32  ;;  %6148 = vmatprep.mubr.msk.f32.mxu1 %vm447_vm0, %v1336_v32 }
 0x10b   : > { %v1024_v37 = vmul.f32 0.16666667, %v992_v27  ;;  %v962_v38 = vmin.f32 %v930_v28, 6.0  ;;  %v900_v39 = vadd.f32 3.0, %v810_v29  ;;  %5952 = vmatmul.mubr.msk.f32.gmra.mrb[42].mxu0 %vm447_vm0, %v1337_v36  ;;  %6149 = vmatmul.mubr.msk.f32.gmra.mrb[8].mxu1 %vm447_vm0, %v1337_v36 }
 0x10c   : > { %v1023_v40 = vmul.f32 0.16666667, %v991_v33  ;;  %v961_v41 = vmin.f32 %v929_v34, 6.0  ;;  %v899_v43 = vadd.f32 3.0, %v805_v35  ;;  %v5908_v45 = vpop.f32.mrb[18].mxu0  ;;  %v7105_v55 = vld [vmem:[#allocation2 + $0xb0] sm:$0xff] }
 0x10d   : > { %1057 = vst.msk [vmem:[#allocation2 + $0xf0] sm:$0xff] %vm447_vm0, %v1024_v37  ;;  %v994_v46 = vmul.f32 %v962_v38, %v800_v13  ;;  %v932_v47 = vmax.f32 %v900_v39, 0.0  ;;  %v820_v48 = vadd.f32 %v5908_v45, %v7031_v44  ;;  %v814_v49 = vpop.f32.mrb[19].mxu0  ;;  %v7097_v50 = vld [vmem:[#allocation2 + $0xa8] sm:$0xff]  ;;  %8124 = vst [vmem:[#allocation4_spill] sm:$0xff] %v7105_v55 }
 0x10e   : > { %8123 = vst [vmem:[#allocation3_spill] sm:$0xff] %v7097_v50  ;;  %1056 = vst.msk [vmem:[#allocation2 + $0xe8] sm:$0xff] %vm447_vm0, %v1023_v40  ;;  %v993_v51 = vmul.f32 %v961_v41, %v795_v18  ;;  %v931_v53 = vmax.f32 %v899_v43, 0.0  ;;  %v815_v54 = vadd.f32 %v7031_v44, %v814_v49  ;;  %5954 = vmatprep.mubr.msk.f32.mxu0 %vm447_vm0, %v7097_v50  ;;  %6151 = vmatprep.mubr.msk.f32.mxu1 %vm447_vm0, %v7097_v50 }
 0x10f   : > { %v1026_v56 = vmul.f32 0.16666667, %v994_v46  ;;  %v964_v57 = vmin.f32 %v932_v47, 6.0  ;;  %v902_v58 = vadd.f32 3.0, %v820_v48  ;;  %5955 = vmatmul.mubr.msk.f32.gmra.mrb[44].mxu0 %vm447_vm0, %v7105_v55  ;;  %6152 = vmatmul.mubr.msk.f32.gmra.mrb[10].mxu1 %vm447_vm0, %v7105_v55 }
 0x110   : > { %v1025_v59 = vmul.f32 0.16666667, %v993_v51  ;;  %v963_v60 = vmin.f32 %v931_v53, 6.0  ;;  %v901_v61 = vadd.f32 3.0, %v815_v54  ;;  %v5911_v62 = vpop.f32.mrb[20].mxu0  ;;  %v7121_v6 = vld [vmem:[#allocation2 + $0xd0] sm:$0xff] }
 0x111   : > { %1059 = vst.msk [vmem:[#allocation2 + $0x110] sm:$0xff] %vm447_vm0, %v1026_v56  ;;  %v996_v63 = vmul.f32 %v964_v57, %v810_v29  ;;  %v934_v0 = vmax.f32 %v902_v58, 0.0  ;;  %v830_v1 = vadd.f32 %v5911_v62, %v7031_v44  ;;  %v824_v2 = vpop.f32.mrb[21].mxu0  ;;  %v7113_v3 = vld [vmem:[#allocation2 + $0xc8] sm:$0xff]  ;;  %8126 = vst [vmem:[#allocation6_spill] sm:$0xff] %v7121_v6 }
 0x112   : > { %8125 = vst [vmem:[#allocation5_spill] sm:$0xff] %v7113_v3  ;;  %1058 = vst.msk [vmem:[#allocation2 + $0x108] sm:$0xff] %vm447_vm0, %v1025_v59  ;;  %v995_v42 = vmul.f32 %v963_v60, %v805_v35  ;;  %v933_v4 = vmax.f32 %v901_v61, 0.0  ;;  %v825_v5 = vadd.f32 %v7031_v44, %v824_v2  ;;  %5957 = vmatprep.mubr.msk.f32.mxu0 %vm447_vm0, %v7113_v3  ;;  %6154 = vmatprep.mubr.msk.f32.mxu1 %vm447_vm0, %v7113_v3 }
 0x113   : > { %v1028_v7 = vmul.f32 0.16666667, %v996_v63  ;;  %v966_v8 = vmin.f32 %v934_v0, 6.0  ;;  %v904_v9 = vadd.f32 3.0, %v830_v1  ;;  %5958 = vmatmul.mubr.msk.f32.gmra.mrb[46].mxu0 %vm447_vm0, %v7121_v6  ;;  %6155 = vmatmul.mubr.msk.f32.gmra.mrb[12].mxu1 %vm447_vm0, %v7121_v6  ;;  %v2011_v6 = vld [vmem:[#allocation2 + $0x9] sm:$0xff] }
 0x114   : > { %v1027_v10 = vmul.f32 0.16666667, %v995_v42  ;;  %v965_v11 = vmin.f32 %v933_v4, 6.0  ;;  %v903_v12 = vadd.f32 3.0, %v825_v5  ;;  %v5914_v13 = vpop.f32.mrb[22].mxu0  ;;  %v7137_v22 = vld [vmem:[#allocation2 + $0xf0] sm:$0xff] }
 0x115   : > { %1061 = vst.msk [vmem:[#allocation2 + $0x130] sm:$0xff] %vm447_vm0, %v1028_v7  ;;  %v998_v14 = vmul.f32 %v966_v8, %v820_v48  ;;  %v936_v15 = vmax.f32 %v904_v9, 0.0  ;;  %v840_v16 = vadd.f32 %v5914_v13, %v7031_v44  ;;  %v834_v17 = vpop.f32.mrb[23].mxu0  ;;  %v7129_v18 = vld [vmem:[#allocation2 + $0xe8] sm:$0xff]  ;;  %8128 = vst [vmem:[#allocation8_spill] sm:$0xff] %v7137_v22 }
 0x116   : > { %8127 = vst [vmem:[#allocation7_spill] sm:$0xff] %v7129_v18  ;;  %1060 = vst.msk [vmem:[#allocation2 + $0x128] sm:$0xff] %vm447_vm0, %v1027_v10  ;;  %v997_v19 = vmul.f32 %v965_v11, %v815_v54  ;;  %v935_v20 = vmax.f32 %v903_v12, 0.0  ;;  %v835_v21 = vadd.f32 %v7031_v44, %v834_v17  ;;  %5960 = vmatprep.mubr.msk.f32.mxu0 %vm447_vm0, %v7129_v18  ;;  %6157 = vmatprep.mubr.msk.f32.mxu1 %vm447_vm0, %v7129_v18 }
 0x117   : > { %v1030_v23 = vmul.f32 0.16666667, %v998_v14  ;;  %v968_v24 = vmin.f32 %v936_v15, 6.0  ;;  %v906_v25 = vadd.f32 3.0, %v840_v16  ;;  %5961 = vmatmul.mubr.msk.f32.gmra.mrb[48].mxu0 %vm447_vm0, %v7137_v22  ;;  %6158 = vmatmul.mubr.msk.f32.gmra.mrb[14].mxu1 %vm447_vm0, %v7137_v22 }
 0x118   : > { %v1029_v26 = vmul.f32 0.16666667, %v997_v19  ;;  %v967_v27 = vmin.f32 %v935_v20, 6.0  ;;  %v905_v28 = vadd.f32 3.0, %v835_v21  ;;  %v5917_v29 = vpop.f32.mrb[24].mxu0  ;;  %v7153_v39 = vld [vmem:[#allocation2 + $0x110] sm:$0xff] }
 0x119   : > { %1063 = vst.msk [vmem:[#allocation2 + $0x150] sm:$0xff] %vm447_vm0, %v1030_v23  ;;  %v1000_v31 = vmul.f32 %v968_v24, %v830_v1  ;;  %v938_v32 = vmax.f32 %v906_v25, 0.0  ;;  %v850_v33 = vadd.f32 %v5917_v29, %v7031_v44  ;;  %v844_v34 = vpop.f32.mrb[25].mxu0  ;;  %v7145_v35 = vld [vmem:[#allocation2 + $0x108] sm:$0xff]  ;;  %8130 = vst [vmem:[#allocation10_spill] sm:$0xff] %v7153_v39 }
 0x11a   : > { %8129 = vst [vmem:[#allocation9_spill] sm:$0xff] %v7145_v35  ;;  %1062 = vst.msk [vmem:[#allocation2 + $0x148] sm:$0xff] %vm447_vm0, %v1029_v26  ;;  %v999_v36 = vmul.f32 %v967_v27, %v825_v5  ;;  %v937_v37 = vmax.f32 %v905_v28, 0.0  ;;  %v845_v38 = vadd.f32 %v7031_v44, %v844_v34  ;;  %5963 = vmatprep.mubr.msk.f32.mxu0 %vm447_vm0, %v7145_v35  ;;  %6160 = vmatprep.mubr.msk.f32.mxu1 %vm447_vm0, %v7145_v35 }
 0x11b   : > { %v1032_v40 = vmul.f32 0.16666667, %v1000_v31  ;;  %v970_v41 = vmin.f32 %v938_v32, 6.0  ;;  %v908_v43 = vadd.f32 3.0, %v850_v33  ;;  %5964 = vmatmul.mubr.msk.f32.gmra.mrb[50].mxu0 %vm447_vm0, %v7153_v39  ;;  %6161 = vmatmul.mubr.msk.f32.gmra.mrb[16].mxu1 %vm447_vm0, %v7153_v39 }
 0x11c   : > { %v1031_v45 = vmul.f32 0.16666667, %v999_v36  ;;  %v969_v46 = vmin.f32 %v937_v37, 6.0  ;;  %v907_v47 = vadd.f32 3.0, %v845_v38  ;;  %v5920_v48 = vpop.f32.mrb[26].mxu0  ;;  %v7169_v60 = vld [vmem:[#allocation2 + $0x130] sm:$0xff] }
 0x11d   : > { %1065 = vst.msk [vmem:[#allocation2 + $0x170] sm:$0xff] %vm447_vm0, %v1032_v40  ;;  %v1002_v49 = vmul.f32 %v970_v41, %v840_v16  ;;  %v940_v51 = vmax.f32 %v908_v43, 0.0  ;;  %v860_v53 = vadd.f32 %v5920_v48, %v7031_v44  ;;  %v854_v54 = vpop.f32.mrb[27].mxu0  ;;  %v7161_v56 = vld [vmem:[#allocation2 + $0x128] sm:$0xff]  ;;  %8132 = vst [vmem:[#allocation12_spill] sm:$0xff] %v7169_v60 }
 0x11e   : > { %8131 = vst [vmem:[#allocation11_spill] sm:$0xff] %v7161_v56  ;;  %1064 = vst.msk [vmem:[#allocation2 + $0x168] sm:$0xff] %vm447_vm0, %v1031_v45  ;;  %v1001_v57 = vmul.f32 %v969_v46, %v835_v21  ;;  %v939_v58 = vmax.f32 %v907_v47, 0.0  ;;  %v855_v59 = vadd.f32 %v7031_v44, %v854_v54  ;;  %5966 = vmatprep.mubr.msk.f32.mxu0 %vm447_vm0, %v7161_v56  ;;  %6163 = vmatprep.mubr.msk.f32.mxu1 %vm447_vm0, %v7161_v56 }
 0x11f   : > { %v1034_v61 = vmul.f32 0.16666667, %v1002_v49  ;;  %v972_v62 = vmin.f32 %v940_v51, 6.0  ;;  %v910_v63 = vadd.f32 3.0, %v860_v53  ;;  %5967 = vmatmul.mubr.msk.f32.gmra.mrb[52].mxu0 %vm447_vm0, %v7169_v60  ;;  %6164 = vmatmul.mubr.msk.f32.gmra.mrb[18].mxu1 %vm447_vm0, %v7169_v60 }
 0x120   : > { %v1033_v0 = vmul.f32 0.16666667, %v1001_v57  ;;  %v971_v1 = vmin.f32 %v939_v58, 6.0  ;;  %v909_v2 = vadd.f32 3.0, %v855_v59  ;;  %v5923_v42 = vpop.f32.mrb[28].mxu0  ;;  %v7185_v13 = vld [vmem:[#allocation2 + $0x150] sm:$0xff] }
 0x121   : > { %1067 = vst.msk [vmem:[#allocation2 + $0x190] sm:$0xff] %vm447_vm0, %v1034_v61  ;;  %v1004_v4 = vmul.f32 %v972_v62, %v850_v33  ;;  %v942_v5 = vmax.f32 %v910_v63, 0.0  ;;  %v870_v7 = vadd.f32 %v5923_v42, %v7031_v44  ;;  %v864_v8 = vpop.f32.mrb[29].mxu0  ;;  %v7177_v9 = vld [vmem:[#allocation2 + $0x148] sm:$0xff]  ;;  %8134 = vst [vmem:[#allocation14_spill] sm:$0xff] %v7185_v13 }
 0x122   : > { %8133 = vst [vmem:[#allocation13_spill] sm:$0xff] %v7177_v9  ;;  %1066 = vst.msk [vmem:[#allocation2 + $0x188] sm:$0xff] %vm447_vm0, %v1033_v0  ;;  %v1003_v10 = vmul.f32 %v971_v1, %v845_v38  ;;  %v941_v11 = vmax.f32 %v909_v2, 0.0  ;;  %v865_v12 = vadd.f32 %v7031_v44, %v864_v8  ;;  %5969 = vmatprep.mubr.msk.f32.mxu0 %vm447_vm0, %v7177_v9  ;;  %6166 = vmatprep.mubr.msk.f32.mxu1 %vm447_vm0, %v7177_v9  ;;  %v1295_v2 = vld [vmem:[#allocation2 + $0x7] sm:$0xff] }
 0x123   : > { %v1036_v14 = vmul.f32 0.16666667, %v1004_v4  ;;  %v974_v15 = vmin.f32 %v942_v5, 6.0  ;;  %v912_v16 = vadd.f32 3.0, %v870_v7  ;;  %5970 = vmatmul.mubr.msk.f32.gmra.mrb[54].mxu0 %vm447_vm0, %v7185_v13  ;;  %6167 = vmatmul.mubr.msk.f32.gmra.mrb[20].mxu1 %vm447_vm0, %v7185_v13  ;;  %v1296_v4 = vld [vmem:[#allocation2 + $0xf] sm:$0xff]  ;;  %v7271_v8 = vld [vmem:[#allocation2 + $0x27] sm:$0xff] }
 0x124   : > { %v1035_v17 = vmul.f32 0.16666667, %v1003_v10  ;;  %v973_v19 = vmin.f32 %v941_v11, 6.0  ;;  %v911_v20 = vadd.f32 3.0, %v865_v12  ;;  %v5926_v21 = vpop.f32.mrb[30].mxu0  ;;  %v7201_v32 = vld [vmem:[#allocation2 + $0x170] sm:$0xff] }
 0x125   : > { %1069 = vst.msk [vmem:[#allocation2 + $0x1b0] sm:$0xff] %vm447_vm0, %v1036_v14  ;;  %v1006_v23 = vmul.f32 %v974_v15, %v860_v53  ;;  %v944_v24 = vmax.f32 %v912_v16, 0.0  ;;  %v880_v25 = vadd.f32 %v5926_v21, %v7031_v44  ;;  %v874_v26 = vpop.f32.mrb[31].mxu0  ;;  %v7193_v27 = vld [vmem:[#allocation2 + $0x168] sm:$0xff]  ;;  %8136 = vst [vmem:[#allocation16_spill] sm:$0xff] %v7201_v32  ;;  %v7288_v14 = vld [vmem:[#allocation2 + $0x31] sm:$0xff] }
 0x126   : > { %8135 = vst [vmem:[#allocation15_spill] sm:$0xff] %v7193_v27  ;;  %1068 = vst.msk [vmem:[#allocation2 + $0x1a8] sm:$0xff] %vm447_vm0, %v1035_v17  ;;  %v1005_v28 = vmul.f32 %v973_v19, %v855_v59  ;;  %v943_v29 = vmax.f32 %v911_v20, 0.0  ;;  %v875_v31 = vadd.f32 %v7031_v44, %v874_v26  ;;  %5972 = vmatprep.mubr.msk.f32.mxu0 %vm447_vm0, %v7193_v27  ;;  %6169 = vmatprep.mubr.msk.f32.mxu1 %vm447_vm0, %v7193_v27  ;;  %v7273_v10 = vld [vmem:[#allocation2 + $0x29] sm:$0xff]  ;;  %v7293_v15 = vld [vmem:[%s8091_s5 + $0x1c] sm:$0xf] }
 0x127   : > { %v1038_v33 = vmul.f32 0.16666667, %v1006_v23  ;;  %v976_v34 = vmin.f32 %v944_v24, 6.0  ;;  %v914_v36 = vadd.f32 3.0, %v880_v25  ;;  %5973 = vmatmul.mubr.msk.f32.gmra.mrb[56].mxu0 %vm447_vm0, %v7201_v32  ;;  %6170 = vmatmul.mubr.msk.f32.gmra.mrb[22].mxu1 %vm447_vm0, %v7201_v32  ;;  %8147 = vst [vmem:[#allocation27_spill] sm:$0xff] %v7271_v8  ;;  %v7301_v16 = vld [vmem:[#allocation2 + $0x47] sm:$0xff] }
 0x128   : > { %v1037_v37 = vmul.f32 0.16666667, %v1005_v28  ;;  %v975_v38 = vmin.f32 %v943_v29, 6.0  ;;  %v913_v44 = vadd.f32 3.0, %v875_v31  ;;  %v7215_v47 = vld [vmem:[#allocation2 + $0x190] sm:$0xff]  ;;  %v7337_v24 = vld [vmem:[#allocation2 + $0x87] sm:$0xff] }
 0x129   : > { %1071 = vst.msk [vmem:[#allocation2 + $0x1d0] sm:$0xff] %vm447_vm0, %v1038_v33  ;;  %v1008_v40 = vmul.f32 %v976_v34, %v870_v7  ;;  %v946_v41 = vmax.f32 %v914_v36, 0.0  ;;  %v7208_v43 = vld [vmem:[#allocation2 + $0x188] sm:$0xff]  ;;  %8138 = vst [vmem:[#allocation18_spill] sm:$0xff] %v7215_v47  ;;  %v7315_v19 = vld [vmem:[#allocation2 + $0x51] sm:$0xff]  ;;  %v5931_v29 = vpop.f32.mrb[32].mxu0 }
 0x12a   : > { %8137 = vst [vmem:[#allocation17_spill] sm:$0xff] %v7208_v43  ;;  %1070 = vst.msk [vmem:[#allocation2 + $0x1c8] sm:$0xff] %vm447_vm0, %v1037_v37  ;;  %v1007_v45 = vmul.f32 %v975_v38, %v865_v12  ;;  %v945_v46 = vmax.f32 %v913_v44, 0.0  ;;  %5975 = vmatprep.mubr.msk.f32.mxu0 %vm447_vm0, %v7208_v43  ;;  %6172 = vmatprep.mubr.msk.f32.mxu1 %vm447_vm0, %v7208_v43  ;;  %v7278_v11 = vld [vmem:[%s8091_s5 + $0xc] sm:$0xf]  ;;  %v7331_v23 = vld [vmem:[#allocation2 + $0x71] sm:$0xff] }
 0x12b   : > { %v1040_v48 = vmul.f32 0.16666667, %v1008_v40  ;;  %v978_v49 = vmin.f32 %v946_v41, 6.0  ;;  %5976 = vmatmul.mubr.msk.f32.gmra.mrb[58].mxu0 %vm447_vm0, %v7215_v47  ;;  %6173 = vmatmul.mubr.msk.f32.gmra.mrb[24].mxu1 %vm447_vm0, %v7215_v47  ;;  %v7286_v12 = vld [vmem:[#allocation2 + $0x2f] sm:$0xff]  ;;  %v1158_v34 = vpop.f32.mrb[33].mxu0  ;;  %v5936_v36 = vpop.f32.mrb[0].mxu1 }
 0x12c   : > { %v1039_v51 = vmul.f32 0.16666667, %v1007_v45  ;;  %v977_v53 = vmin.f32 %v945_v46, 6.0  ;;  %v7229_v59 = vld [vmem:[#allocation2 + $0x1b0] sm:$0xff]  ;;  %8148 = vst [vmem:[#allocation28_spill] sm:$0xff] %v7286_v12  ;;  %v1267_v44 = vpop.f32.mrb[1].mxu1 }
 0x12d   : > { %1073 = vst.msk [vmem:[#allocation2 + $0x1f0] sm:$0xff] %vm447_vm0, %v1040_v48  ;;  %v1010_v54 = vmul.f32 %v978_v49, %v880_v25  ;;  %v7222_v57 = vld [vmem:[#allocation2 + $0x1a8] sm:$0xff]  ;;  %8140 = vst [vmem:[#allocation20_spill] sm:$0xff] %v7229_v59  ;;  %v7347_v28 = vld [vmem:[#allocation2 + $0x91] sm:$0xff] }
 0x12e   : > { %8139 = vst [vmem:[#allocation19_spill] sm:$0xff] %v7222_v57  ;;  %1072 = vst.msk [vmem:[#allocation2 + $0x1e8] sm:$0xff] %vm447_vm0, %v1039_v51  ;;  %v1009_v58 = vmul.f32 %v977_v53, %v875_v31  ;;  %5978 = vmatprep.mubr.msk.f32.mxu0 %vm447_vm0, %v7222_v57  ;;  %6175 = vmatprep.mubr.msk.f32.mxu1 %vm447_vm0, %v7222_v57  ;;  %v7313_v17 = vld [vmem:[#allocation2 + $0x4f] sm:$0xff]  ;;  %v7353_v31 = vld [vmem:[#allocation2 + $0xa7] sm:$0xff] }
 0x12f   : > { %v1042_v61 = vmul.f32 0.16666667, %v1010_v54  ;;  %5979 = vmatmul.mubr.msk.f32.gmra.mrb[60].mxu0 %vm447_vm0, %v7229_v59  ;;  %6176 = vmatmul.mubr.msk.f32.gmra.mrb[26].mxu1 %vm447_vm0, %v7229_v59  ;;  %v7323_v20 = vld [vmem:[#allocation2 + $0x69] sm:$0xff]  ;;  %v7363_v38 = vld [vmem:[#allocation2 + $0xb1] sm:$0xff] }
 0x130   : > { %v1041_v62 = vmul.f32 0.16666667, %v1009_v58  ;;  %v7243_v0 = vld [vmem:[#allocation2 + $0x1d0] sm:$0xff]  ;;  %v7369_v40 = vld [vmem:[#allocation2 + $0xc7] sm:$0xff] }
 0x131   : > { %1075 = vst.msk [vmem:[#allocation2 + $0x210] sm:$0xff] %vm447_vm0, %v1042_v61  ;;  %v7236_v63 = vld [vmem:[#allocation2 + $0x1c8] sm:$0xff]  ;;  %8142 = vst [vmem:[#allocation22_spill] sm:$0xff] %v7243_v0  ;;  %v7379_v46 = vld [vmem:[#allocation2 + $0xd1] sm:$0xff] }
 0x132   : > { %8141 = vst [vmem:[#allocation21_spill] sm:$0xff] %v7236_v63  ;;  %1074 = vst.msk [vmem:[#allocation2 + $0x208] sm:$0xff] %vm447_vm0, %v1041_v62  ;;  %5981 = vmatprep.mubr.msk.f32.mxu0 %vm447_vm0, %v7236_v63  ;;  %6178 = vmatprep.mubr.msk.f32.mxu1 %vm447_vm0, %v7236_v63  ;;  %v7329_v21 = vld [vmem:[#allocation2 + $0x6f] sm:$0xff]  ;;  %v7385_v48 = vld [vmem:[#allocation2 + $0xe7] sm:$0xff] }
 0x133   : > { %5982 = vmatmul.mubr.msk.f32.gmra.mrb[62].mxu0 %vm447_vm0, %v7243_v0  ;;  %6179 = vmatmul.mubr.msk.f32.gmra.mrb[28].mxu1 %vm447_vm0, %v7243_v0  ;;  %v7339_v25 = vld [vmem:[#allocation2 + $0x89] sm:$0xff]  ;;  %v7395_v53 = vld [vmem:[#allocation2 + $0xf1] sm:$0xff] }
 0x134   : > { %v7255_v42 = vld [vmem:[#allocation2 + $0x1f0] sm:$0xff]  ;;  %v7401_v54 = vld [vmem:[#allocation2 + $0x107] sm:$0xff] }
 0x135   : > { %v7249_v1 = vld [vmem:[#allocation2 + $0x1e8] sm:$0xff]  ;;  %8144 = vst [vmem:[#allocation24_spill] sm:$0xff] %v7255_v42  ;;  %v7411_v62 = vld [vmem:[#allocation2 + $0x111] sm:$0xff] }
 0x136   : > { %8143 = vst [vmem:[#allocation23_spill] sm:$0xff] %v7249_v1  ;;  %5984 = vmatprep.mubr.msk.f32.mxu0 %vm447_vm0, %v7249_v1  ;;  %6181 = vmatprep.mubr.msk.f32.mxu1 %vm447_vm0, %v7249_v1  ;;  %v7345_v26 = vld [vmem:[#allocation2 + $0x8f] sm:$0xff]  ;;  %v7433_v36 = vld [vmem:[#allocation2 + $0x147] sm:$0xff] }
 0x137   : > { %5985 = vmatmul.mubr.msk.f32.gmra.mrb[64].mxu0 %vm447_vm0, %v7255_v42  ;;  %6182 = vmatmul.mubr.msk.f32.gmra.mrb[30].mxu1 %vm447_vm0, %v7255_v42  ;;  %v7355_v33 = vld [vmem:[#allocation2 + $0xa9] sm:$0xff]  ;;  %v7427_v34 = vld [vmem:[#allocation2 + $0x131] sm:$0xff] }
 0x138   : > { %5989 = vmatprep.mubr.msk.f32.mxu0 %vm447_vm0, %v1295_v2  ;;  %v7266_v7 = vld [vmem:[#allocation2 + $0x210] sm:$0xff]  ;;  %v7417_v2 = vld [vmem:[#allocation2 + $0x127] sm:$0xff] }
 0x139   : > { %v7262_v5 = vld [vmem:[#allocation2 + $0x208] sm:$0xff]  ;;  %8146 = vst [vmem:[#allocation26_spill] sm:$0xff] %v7266_v7  ;;  %v7459_v63 = vld [vmem:[#allocation2 + $0x171] sm:$0xff] }
 0x13a   : > { %8145 = vst [vmem:[#allocation25_spill] sm:$0xff] %v7262_v5  ;;  %6184 = vmatprep.mubr.msk.f32.mxu1 %vm447_vm0, %v7262_v5  ;;  %v7361_v37 = vld [vmem:[#allocation2 + $0xaf] sm:$0xff]  ;;  %v7449_v42 = vld [vmem:[#allocation2 + $0x167] sm:$0xff] }
 0x13b   : > { %5990 = vmatmul.mubr.msk.f32.vlgmr.msra.gmra.mrb[34].mxu0 %vm447_vm0, %v1296_v4  ;;  %6185 = vmatmul.mubr.msk.f32.gmra.mrb[32].mxu1 %vm447_vm0, %v7266_v7  ;;  %v7371_v41 = vld [vmem:[#allocation2 + $0xc9] sm:$0xff]  ;;  %v7443_v5 = vld [vmem:[#allocation2 + $0x151] sm:$0xff] }
 0x13c   : > { %5992 = vmatprep.mubr.msk.f32.mxu0 %vm447_vm0, %v7271_v8  ;;  %6189 = vmatprep.mubr.msk.f32.mxu1 %vm447_vm0, %v7273_v10  ;;  %v7377_v45 = vld [vmem:[#allocation2 + $0xcf] sm:$0xff]  ;;  %v7465_v59 = vld [vmem:[#allocation2 + $0x187] sm:$0xff] }
 0x13d   : > { %6038 = vmatpush3.msk.msra.mxu0 %vm1458_vm3, %v7048_v30  ;;  %v7307_v30 = vld [vmem:[#allocation2 + $0x49] sm:$0xff]  ;;  %v7475_v43 = vld [vmem:[#allocation2 + $0x191] sm:$0xff] }
 0x13e   : > { %6087 = vmatprep.subr.msk.mxu0 %vm1458_vm3, %v7278_v11  ;;  %v7387_v49 = vld [vmem:[#allocation2 + $0xe9] sm:$0xff]  ;;  %v7491_v9 = vld [vmem:[#allocation2 + $0x1b1] sm:$0xff] }
 0x13f   : > { %5993 = vmatmul.mubr.msk.f32.gmra.mrb[36].mxu0 %vm447_vm0, %v7286_v12  ;;  %6190 = vmatmul.mubr.msk.f32.vlgmr.msra.gmra.mrb[2].mxu1 %vm447_vm0, %v7288_v14  ;;  %v7393_v51 = vld [vmem:[#allocation2 + $0xef] sm:$0xff]  ;;  %v7481_v32 = vld [vmem:[#allocation2 + $0x1a7] sm:$0xff] }
 0x140   : > { %6238 = vmatpush3.msk.msra.mxu1 %vm1458_vm3, %v7063_v52  ;;  %5995 = vmatprep.mubr.msk.f32.mxu0 %vm447_vm0, %v7301_v16  ;;  %v7321_v52 = vld [vmem:[#allocation2 + $0x67] sm:$0xff]  ;;  %v7409_v61 = vld [vmem:[#allocation2 + $0x10f] sm:$0xff] }
 0x141   : > { %6192 = vmatprep.mubr.msk.f32.mxu1 %vm447_vm0, %v7307_v30  ;;  %6287 = vmatprep.subr.msk.mxu1 %vm1458_vm3, %v7293_v15  ;;  %v7403_v58 = vld [vmem:[#allocation2 + $0x109] sm:$0xff]  ;;  %v7507_v35 = vld [vmem:[#allocation2 + $0x1d1] sm:$0xff] }
 0x142   : > { %v7419_v4 = vld [vmem:[#allocation2 + $0x129] sm:$0xff]  ;;  %v7523_v55 = vld [vmem:[#allocation2 + $0x1f1] sm:$0xff] }
 0x143   : > { %5996 = vmatmul.mubr.msk.f32.gmra.mrb[38].mxu0 %vm447_vm0, %v7313_v17  ;;  %6193 = vmatmul.mubr.msk.f32.gmra.mrb[4].mxu1 %vm447_vm0, %v7315_v19  ;;  %v7425_v29 = vld [vmem:[#allocation2 + $0x12f] sm:$0xff]  ;;  %v7497_v60 = vld [vmem:[#allocation2 + $0x1c7] sm:$0xff]  ;;  %8149 = vst [vmem:[#allocation29_spill] sm:$0xff] %v7523_v55 }
 0x144   : > { %5998 = vmatprep.mubr.msk.f32.mxu0 %vm447_vm0, %v7321_v52  ;;  %6195 = vmatprep.mubr.msk.f32.mxu1 %vm447_vm0, %v7323_v20  ;;  %v7435_v44 = vld [vmem:[#allocation2 + $0x149] sm:$0xff]  ;;  %v2012_v12 = vld [vmem:[#allocation2 + $0x11] sm:$0xff] }
 0x145   : > { %v7441_v7 = vld [vmem:[#allocation2 + $0x14f] sm:$0xff]  ;;  %v7513_v22 = vld [vmem:[#allocation2 + $0x1e7] sm:$0xff] }
 0x146   : > { %v7451_v1 = vld [vmem:[#allocation2 + $0x169] sm:$0xff]  ;;  %v7534_v8 = vld [vmem:[#allocation2 + $0x211] sm:$0xff] }
 0x147   : > { %5999 = vmatmul.mubr.msk.f32.gmra.mrb[40].mxu0 %vm447_vm0, %v7329_v21  ;;  %6196 = vmatmul.mubr.msk.f32.gmra.mrb[6].mxu1 %vm447_vm0, %v7331_v23  ;;  %v7457_v0 = vld [vmem:[#allocation2 + $0x16f] sm:$0xff]  ;;  %8151 = vst [vmem:[#allocation31_spill] sm:$0xff] %v7534_v8 }
 0x148   : > { %6001 = vmatprep.mubr.msk.f32.mxu0 %vm447_vm0, %v7337_v24  ;;  %6198 = vmatprep.mubr.msk.f32.mxu1 %vm447_vm0, %v7339_v25  ;;  %v7467_v57 = vld [vmem:[#allocation2 + $0x189] sm:$0xff] }
 0x149   : > { %v7473_v47 = vld [vmem:[#allocation2 + $0x18f] sm:$0xff] }
 0x14a   : > { %v7483_v27 = vld [vmem:[#allocation2 + $0x1a9] sm:$0xff] }
 0x14b   : > { %6002 = vmatmul.mubr.msk.f32.gmra.mrb[42].mxu0 %vm447_vm0, %v7345_v26  ;;  %6199 = vmatmul.mubr.msk.f32.gmra.mrb[8].mxu1 %vm447_vm0, %v7347_v28  ;;  %v7489_v13 = vld [vmem:[#allocation2 + $0x1af] sm:$0xff] }
 0x14c   : > { %6004 = vmatprep.mubr.msk.f32.mxu0 %vm447_vm0, %v7353_v31  ;;  %6201 = vmatprep.mubr.msk.f32.mxu1 %vm447_vm0, %v7355_v33  ;;  %v7499_v56 = vld [vmem:[#allocation2 + $0x1c9] sm:$0xff] }
 0x14d   : > { %v7505_v39 = vld [vmem:[#allocation2 + $0x1cf] sm:$0xff] }
 0x14e   : > { %v7515_v18 = vld [vmem:[#allocation2 + $0x1e9] sm:$0xff] }
 0x14f   : > { %6005 = vmatmul.mubr.msk.f32.gmra.mrb[44].mxu0 %vm447_vm0, %v7361_v37  ;;  %6202 = vmatmul.mubr.msk.f32.gmra.mrb[10].mxu1 %vm447_vm0, %v7363_v38  ;;  %v7521_v3 = vld [vmem:[#allocation2 + $0x1ef] sm:$0xff] }
 0x150   : > { %6007 = vmatprep.mubr.msk.f32.mxu0 %vm447_vm0, %v7369_v40  ;;  %6204 = vmatprep.mubr.msk.f32.mxu1 %vm447_vm0, %v7371_v41  ;;  %v7529_v50 = vld [vmem:[#allocation2 + $0x209] sm:$0xff] }
 0x151   : > { %8150 = vst [vmem:[#allocation30_spill] sm:$0xff] %v7529_v50 }
 0x153   : > { %6008 = vmatmul.mubr.msk.f32.gmra.mrb[46].mxu0 %vm447_vm0, %v7377_v45  ;;  %6205 = vmatmul.mubr.msk.f32.gmra.mrb[12].mxu1 %vm447_vm0, %v7379_v46 }
 0x154   : > { %6010 = vmatprep.mubr.msk.f32.mxu0 %vm447_vm0, %v7385_v48  ;;  %6207 = vmatprep.mubr.msk.f32.mxu1 %vm447_vm0, %v7387_v49 }
 0x157   : > { %6011 = vmatmul.mubr.msk.f32.gmra.mrb[48].mxu0 %vm447_vm0, %v7393_v51  ;;  %6208 = vmatmul.mubr.msk.f32.gmra.mrb[14].mxu1 %vm447_vm0, %v7395_v53 }
 0x158   : > { %6013 = vmatprep.mubr.msk.f32.mxu0 %vm447_vm0, %v7401_v54  ;;  %6210 = vmatprep.mubr.msk.f32.mxu1 %vm447_vm0, %v7403_v58 }
 0x15b   : > { %6014 = vmatmul.mubr.msk.f32.gmra.mrb[50].mxu0 %vm447_vm0, %v7409_v61  ;;  %6211 = vmatmul.mubr.msk.f32.gmra.mrb[16].mxu1 %vm447_vm0, %v7411_v62 }
 0x15c   : > { %6016 = vmatprep.mubr.msk.f32.mxu0 %vm447_vm0, %v7417_v2  ;;  %6213 = vmatprep.mubr.msk.f32.mxu1 %vm447_vm0, %v7419_v4 }
 0x15f   : > { %6017 = vmatmul.mubr.msk.f32.gmra.mrb[52].mxu0 %vm447_vm0, %v7425_v29  ;;  %6214 = vmatmul.mubr.msk.f32.gmra.mrb[18].mxu1 %vm447_vm0, %v7427_v34 }
 0x160   : > { %6019 = vmatprep.mubr.msk.f32.mxu0 %vm447_vm0, %v7433_v36  ;;  %6216 = vmatprep.mubr.msk.f32.mxu1 %vm447_vm0, %v7435_v44 }
 0x163   : > { %6020 = vmatmul.mubr.msk.f32.gmra.mrb[54].mxu0 %vm447_vm0, %v7441_v7  ;;  %6217 = vmatmul.mubr.msk.f32.gmra.mrb[20].mxu1 %vm447_vm0, %v7443_v5 }
 0x164   : > { %6022 = vmatprep.mubr.msk.f32.mxu0 %vm447_vm0, %v7449_v42  ;;  %6219 = vmatprep.mubr.msk.f32.mxu1 %vm447_vm0, %v7451_v1 }
 0x167   : > { %6023 = vmatmul.mubr.msk.f32.gmra.mrb[56].mxu0 %vm447_vm0, %v7457_v0  ;;  %6220 = vmatmul.mubr.msk.f32.gmra.mrb[22].mxu1 %vm447_vm0, %v7459_v63 }
 0x168   : > { %6025 = vmatprep.mubr.msk.f32.mxu0 %vm447_vm0, %v7465_v59  ;;  %6222 = vmatprep.mubr.msk.f32.mxu1 %vm447_vm0, %v7467_v57 }
 0x16b   : > { %6026 = vmatmul.mubr.msk.f32.gmra.mrb[58].mxu0 %vm447_vm0, %v7473_v47  ;;  %6223 = vmatmul.mubr.msk.f32.gmra.mrb[24].mxu1 %vm447_vm0, %v7475_v43 }
 0x16c   : > { %6028 = vmatprep.mubr.msk.f32.mxu0 %vm447_vm0, %v7481_v32  ;;  %6225 = vmatprep.mubr.msk.f32.mxu1 %vm447_vm0, %v7483_v27 }
 0x16f   : > { %6029 = vmatmul.mubr.msk.f32.gmra.mrb[60].mxu0 %vm447_vm0, %v7489_v13  ;;  %6226 = vmatmul.mubr.msk.f32.gmra.mrb[26].mxu1 %vm447_vm0, %v7491_v9 }
 0x170   : > { %6031 = vmatprep.mubr.msk.f32.mxu0 %vm447_vm0, %v7497_v60  ;;  %6228 = vmatprep.mubr.msk.f32.mxu1 %vm447_vm0, %v7499_v56 }
 0x173   : > { %6032 = vmatmul.mubr.msk.f32.gmra.mrb[62].mxu0 %vm447_vm0, %v7505_v39  ;;  %6229 = vmatmul.mubr.msk.f32.gmra.mrb[28].mxu1 %vm447_vm0, %v7507_v35 }
 0x174   : > { %6034 = vmatprep.mubr.msk.f32.mxu0 %vm447_vm0, %v7513_v22  ;;  %6231 = vmatprep.mubr.msk.f32.mxu1 %vm447_vm0, %v7515_v18 }
 0x177   : > { %6035 = vmatmul.mubr.msk.f32.gmra.mrb[64].mxu0 %vm447_vm0, %v7521_v3  ;;  %6232 = vmatmul.mubr.msk.f32.gmra.mrb[30].mxu1 %vm447_vm0, %v7523_v55 }
 0x178   : > { %6234 = vmatprep.mubr.msk.f32.mxu1 %vm447_vm0, %v7529_v50  ;;  %6039 = vmatprep.mubr.msk.f32.mxu0 %vm447_vm0, %v2011_v6  ;;  %v7548_v6 = vld [vmem:[%s8091_s5 + $0x20] sm:$0xf]  ;;  %v3962_v50 = vld [vmem:[#allocation2 + $0x48] sm:$0xff] }
 0x17b   : > { %6040 = vmatmul.mubr.msk.f32.vlgmr.msra.gmra.mrb[34].mxu0 %vm447_vm0, %v2012_v12  ;;  %6235 = vmatmul.mubr.msk.f32.gmra.mrb[32].mxu1 %vm447_vm0, %v7534_v8  ;;  %v7668_v12 = vld [vmem:[#allocation2 + $0x20f] sm:$0xff] }
 0x17c   : > { %6042 = vmatprep.mubr.msk.f32.mxu0 %vm447_vm0, %v7273_v10  ;;  %6239 = vmatprep.mubr.msk.f32.mxu1 %vm447_vm0, %v7301_v16  ;;  %v7662_v10 = vld [vmem:[#allocation2 + $0x207] sm:$0xff] }
 0x17d   : > { %6088 = vmatpush3.msk.msra.mxu0 %vm1458_vm3, %v7278_v11  ;;  %v3602_v11 = vld [vmem:[#allocation2 + $0x227] sm:$0xff] }
 0x17e   : > { %v8153_v8 = vld [vmem:[#allocation28_spill] sm:$0xff] }
 0x17f   : > { %6043 = vmatmul.mubr.msk.f32.gmra.mrb[36].mxu0 %vm447_vm0, %v7288_v14  ;;  %6240 = vmatmul.mubr.msk.f32.vlgmr.msra.gmra.mrb[2].mxu1 %vm447_vm0, %v7313_v17  ;;  %v8152_v14 = vld [vmem:[#allocation27_spill] sm:$0xff] }
 0x180   : > { %6288 = vmatpush3.msk.msra.mxu1 %vm1458_vm3, %v7293_v15  ;;  %6045 = vmatprep.mubr.msk.f32.mxu0 %vm447_vm0, %v7307_v30  ;;  %v3603_v15 = vld [vmem:[#allocation2 + $0x22f] sm:$0xff] }
 0x181   : > { %6242 = vmatprep.mubr.msk.f32.mxu1 %vm447_vm0, %v7321_v52  ;;  %6337 = vmatprep.subr.msk.mxu1 %vm1458_vm3, %v7548_v6 }
 0x183   : > { %6046 = vmatmul.mubr.msk.f32.gmra.mrb[38].mxu0 %vm447_vm0, %v7315_v19  ;;  %6243 = vmatmul.mubr.msk.f32.gmra.mrb[4].mxu1 %vm447_vm0, %v7329_v21 }
 0x184   : > { %6048 = vmatprep.mubr.msk.f32.mxu0 %vm447_vm0, %v7323_v20  ;;  %6245 = vmatprep.mubr.msk.f32.mxu1 %vm447_vm0, %v7337_v24 }
 0x187   : > { %6049 = vmatmul.mubr.msk.f32.gmra.mrb[40].mxu0 %vm447_vm0, %v7331_v23  ;;  %6246 = vmatmul.mubr.msk.f32.gmra.mrb[6].mxu1 %vm447_vm0, %v7345_v26 }
 0x188   : > { %6051 = vmatprep.mubr.msk.f32.mxu0 %vm447_vm0, %v7339_v25  ;;  %6248 = vmatprep.mubr.msk.f32.mxu1 %vm447_vm0, %v7353_v31 }
 0x18b   : > { %6052 = vmatmul.mubr.msk.f32.gmra.mrb[42].mxu0 %vm447_vm0, %v7347_v28  ;;  %6249 = vmatmul.mubr.msk.f32.gmra.mrb[8].mxu1 %vm447_vm0, %v7361_v37 }
 0x18c   : > { %6054 = vmatprep.mubr.msk.f32.mxu0 %vm447_vm0, %v7355_v33  ;;  %6251 = vmatprep.mubr.msk.f32.mxu1 %vm447_vm0, %v7369_v40 }
 0x18f   : > { %6055 = vmatmul.mubr.msk.f32.gmra.mrb[44].mxu0 %vm447_vm0, %v7363_v38  ;;  %6252 = vmatmul.mubr.msk.f32.gmra.mrb[10].mxu1 %vm447_vm0, %v7377_v45 }
 0x190   : > { %6057 = vmatprep.mubr.msk.f32.mxu0 %vm447_vm0, %v7371_v41  ;;  %6254 = vmatprep.mubr.msk.f32.mxu1 %vm447_vm0, %v7385_v48 }
 0x193   : > { %6058 = vmatmul.mubr.msk.f32.gmra.mrb[46].mxu0 %vm447_vm0, %v7379_v46  ;;  %6255 = vmatmul.mubr.msk.f32.gmra.mrb[12].mxu1 %vm447_vm0, %v7393_v51 }
 0x194   : > { %6060 = vmatprep.mubr.msk.f32.mxu0 %vm447_vm0, %v7387_v49  ;;  %6257 = vmatprep.mubr.msk.f32.mxu1 %vm447_vm0, %v7401_v54 }
 0x197   : > { %6061 = vmatmul.mubr.msk.f32.gmra.mrb[48].mxu0 %vm447_vm0, %v7395_v53  ;;  %6258 = vmatmul.mubr.msk.f32.gmra.mrb[14].mxu1 %vm447_vm0, %v7409_v61 }
 0x198   : > { %6063 = vmatprep.mubr.msk.f32.mxu0 %vm447_vm0, %v7403_v58  ;;  %6260 = vmatprep.mubr.msk.f32.mxu1 %vm447_vm0, %v7417_v2 }
 0x19b   : > { %6064 = vmatmul.mubr.msk.f32.gmra.mrb[50].mxu0 %vm447_vm0, %v7411_v62  ;;  %6261 = vmatmul.mubr.msk.f32.gmra.mrb[16].mxu1 %vm447_vm0, %v7425_v29 }
 0x19c   : > { %6066 = vmatprep.mubr.msk.f32.mxu0 %vm447_vm0, %v7419_v4  ;;  %6263 = vmatprep.mubr.msk.f32.mxu1 %vm447_vm0, %v7433_v36 }
 0x19f   : > { %6067 = vmatmul.mubr.msk.f32.gmra.mrb[52].mxu0 %vm447_vm0, %v7427_v34  ;;  %6264 = vmatmul.mubr.msk.f32.gmra.mrb[18].mxu1 %vm447_vm0, %v7441_v7 }
 0x1a0   : > { %6069 = vmatprep.mubr.msk.f32.mxu0 %vm447_vm0, %v7435_v44  ;;  %6266 = vmatprep.mubr.msk.f32.mxu1 %vm447_vm0, %v7449_v42 }
 0x1a3   : > { %6070 = vmatmul.mubr.msk.f32.gmra.mrb[54].mxu0 %vm447_vm0, %v7443_v5  ;;  %6267 = vmatmul.mubr.msk.f32.gmra.mrb[20].mxu1 %vm447_vm0, %v7457_v0 }
 0x1a4   : > { %6072 = vmatprep.mubr.msk.f32.mxu0 %vm447_vm0, %v7451_v1  ;;  %6269 = vmatprep.mubr.msk.f32.mxu1 %vm447_vm0, %v7465_v59 }
 0x1a7   : > { %6073 = vmatmul.mubr.msk.f32.gmra.mrb[56].mxu0 %vm447_vm0, %v7459_v63  ;;  %6270 = vmatmul.mubr.msk.f32.gmra.mrb[22].mxu1 %vm447_vm0, %v7473_v47 }
 0x1a8   : > { %6075 = vmatprep.mubr.msk.f32.mxu0 %vm447_vm0, %v7467_v57  ;;  %6272 = vmatprep.mubr.msk.f32.mxu1 %vm447_vm0, %v7481_v32 }
 0x1ab   : > { %6076 = vmatmul.mubr.msk.f32.gmra.mrb[58].mxu0 %vm447_vm0, %v7475_v43  ;;  %6273 = vmatmul.mubr.msk.f32.gmra.mrb[24].mxu1 %vm447_vm0, %v7489_v13 }
 0x1ac   : > { %6078 = vmatprep.mubr.msk.f32.mxu0 %vm447_vm0, %v7483_v27  ;;  %6275 = vmatprep.mubr.msk.f32.mxu1 %vm447_vm0, %v7497_v60 }
 0x1af   : > { %6079 = vmatmul.mubr.msk.f32.gmra.mrb[60].mxu0 %vm447_vm0, %v7491_v9  ;;  %6276 = vmatmul.mubr.msk.f32.gmra.mrb[26].mxu1 %vm447_vm0, %v7505_v39 }
 0x1b0   : > { %6081 = vmatprep.mubr.msk.f32.mxu0 %vm447_vm0, %v7499_v56  ;;  %6278 = vmatprep.mubr.msk.f32.mxu1 %vm447_vm0, %v7513_v22 }
 0x1b3   : > { %6082 = vmatmul.mubr.msk.f32.gmra.mrb[62].mxu0 %vm447_vm0, %v7507_v35  ;;  %6279 = vmatmul.mubr.msk.f32.gmra.mrb[28].mxu1 %vm447_vm0, %v7521_v3 }
 0x1b4   : > { %6084 = vmatprep.mubr.msk.f32.mxu0 %vm447_vm0, %v7515_v18  ;;  %6281 = vmatprep.mubr.msk.f32.mxu1 %vm447_vm0, %v7662_v10 }
 0x1b7   : > { %6085 = vmatmul.mubr.msk.f32.gmra.mrb[64].mxu0 %vm447_vm0, %v7523_v55  ;;  %6282 = vmatmul.mubr.msk.f32.gmra.mrb[30].mxu1 %vm447_vm0, %v7668_v12  ;;  %v3963_v55 = vld [vmem:[#allocation2 + $0x50] sm:$0xff] }
 0x1b8   : > { %6089 = vmatprep.mubr.msk.f32.mxu0 %vm447_vm0, %v8152_v14  ;;  %6284 = vmatprep.mubr.msk.f32.mxu1 %vm447_vm0, %v3602_v11  ;;  %v3965_v11 = vld [vmem:[#allocation2 + $0x70] sm:$0xff] }
 0x1bb   : > { %6090 = vmatmul.mubr.msk.f32.vlgmr.msra.gmra.mrb[34].mxu0 %vm447_vm0, %v8153_v8  ;;  %6285 = vmatmul.mubr.msk.f32.gmra.mrb[32].mxu1 %vm447_vm0, %v3603_v15  ;;  %v3964_v8 = vld [vmem:[#allocation2 + $0x68] sm:$0xff] }
 0x1bc   : > { %6092 = vmatprep.mubr.msk.f32.mxu0 %vm447_vm0, %v7301_v16  ;;  %6289 = vmatprep.mubr.msk.f32.mxu1 %vm447_vm0, %v3962_v50  ;;  %v3966_v50 = vld [vmem:[#allocation2 + $0x88] sm:$0xff]  ;;  %v8154_v16 = vld [vmem:[#allocation3_spill] sm:$0xff] }
 0x1bf   : > { %6093 = vmatmul.mubr.msk.f32.gmra.mrb[36].mxu0 %vm447_vm0, %v7313_v17  ;;  %6290 = vmatmul.mubr.msk.f32.vlgmr.msra.gmra.mrb[2].mxu1 %vm447_vm0, %v3963_v55  ;;  %v3967_v55 = vld [vmem:[#allocation2 + $0x90] sm:$0xff]  ;;  %v8155_v17 = vld [vmem:[#allocation4_spill] sm:$0xff] }
 0x1c0   : > { %6338 = vmatpush3.msk.msra.mxu1 %vm1458_vm3, %v7548_v6  ;;  %6095 = vmatprep.mubr.msk.f32.mxu0 %vm447_vm0, %v7321_v52  ;;  %v8156_v52 = vld [vmem:[#allocation5_spill] sm:$0xff] }
 0x1c1   : > { %6292 = vmatprep.mubr.msk.f32.mxu1 %vm447_vm0, %v3964_v8 }
 0x1c3   : > { %6096 = vmatmul.mubr.msk.f32.gmra.mrb[38].mxu0 %vm447_vm0, %v7329_v21  ;;  %6293 = vmatmul.mubr.msk.f32.gmra.mrb[4].mxu1 %vm447_vm0, %v3965_v11  ;;  %v8157_v21 = vld [vmem:[#allocation6_spill] sm:$0xff] }
 0x1c4   : > { %6098 = vmatprep.mubr.msk.f32.mxu0 %vm447_vm0, %v7337_v24  ;;  %6295 = vmatprep.mubr.msk.f32.mxu1 %vm447_vm0, %v3966_v50  ;;  %v8158_v24 = vld [vmem:[#allocation7_spill] sm:$0xff] }
 0x1c7   : > { %6099 = vmatmul.mubr.msk.f32.gmra.mrb[40].mxu0 %vm447_vm0, %v7345_v26  ;;  %6296 = vmatmul.mubr.msk.f32.gmra.mrb[6].mxu1 %vm447_vm0, %v3967_v55  ;;  %v8159_v26 = vld [vmem:[#allocation8_spill] sm:$0xff] }
 0x1c8   : > { %6101 = vmatprep.mubr.msk.f32.mxu0 %vm447_vm0, %v7353_v31  ;;  %6298 = vmatprep.mubr.msk.f32.mxu1 %vm447_vm0, %v8154_v16  ;;  %v8160_v31 = vld [vmem:[#allocation9_spill] sm:$0xff]  ;;  %v7915_v16 = vld [vmem:[%s8092_s6] ss:$0 sm:$0xff] }
 0x1cb   : > { %6102 = vmatmul.mubr.msk.f32.gmra.mrb[42].mxu0 %vm447_vm0, %v7361_v37  ;;  %6299 = vmatmul.mubr.msk.f32.gmra.mrb[8].mxu1 %vm447_vm0, %v8155_v17  ;;  %v8161_v37 = vld [vmem:[#allocation10_spill] sm:$0xff] }
 0x1cc   : > { %6104 = vmatprep.mubr.msk.f32.mxu0 %vm447_vm0, %v7369_v40  ;;  %6301 = vmatprep.mubr.msk.f32.mxu1 %vm447_vm0, %v8156_v52  ;;  %v8162_v40 = vld [vmem:[#allocation11_spill] sm:$0xff] }
 0x1cf   : > { %6105 = vmatmul.mubr.msk.f32.gmra.mrb[44].mxu0 %vm447_vm0, %v7377_v45  ;;  %6302 = vmatmul.mubr.msk.f32.gmra.mrb[10].mxu1 %vm447_vm0, %v8157_v21  ;;  %v8163_v45 = vld [vmem:[#allocation12_spill] sm:$0xff] }
 0x1d0   : > { %6107 = vmatprep.mubr.msk.f32.mxu0 %vm447_vm0, %v7385_v48  ;;  %6304 = vmatprep.mubr.msk.f32.mxu1 %vm447_vm0, %v8158_v24  ;;  %v8164_v48 = vld [vmem:[#allocation13_spill] sm:$0xff] }
 0x1d3   : > { %6108 = vmatmul.mubr.msk.f32.gmra.mrb[46].mxu0 %vm447_vm0, %v7393_v51  ;;  %6305 = vmatmul.mubr.msk.f32.gmra.mrb[12].mxu1 %vm447_vm0, %v8159_v26  ;;  %v8165_v51 = vld [vmem:[#allocation14_spill] sm:$0xff] }
 0x1d4   : > { %6110 = vmatprep.mubr.msk.f32.mxu0 %vm447_vm0, %v7401_v54  ;;  %6307 = vmatprep.mubr.msk.f32.mxu1 %vm447_vm0, %v8160_v31  ;;  %v8166_v54 = vld [vmem:[#allocation15_spill] sm:$0xff] }
 0x1d7   : > { %6111 = vmatmul.mubr.msk.f32.gmra.mrb[48].mxu0 %vm447_vm0, %v7409_v61  ;;  %6308 = vmatmul.mubr.msk.f32.gmra.mrb[14].mxu1 %vm447_vm0, %v8161_v37  ;;  %v8167_v61 = vld [vmem:[#allocation16_spill] sm:$0xff] }
 0x1d8   : > { %6113 = vmatprep.mubr.msk.f32.mxu0 %vm447_vm0, %v7417_v2  ;;  %6310 = vmatprep.mubr.msk.f32.mxu1 %vm447_vm0, %v8162_v40  ;;  %v8168_v2 = vld [vmem:[#allocation17_spill] sm:$0xff] }
 0x1db   : > { %6114 = vmatmul.mubr.msk.f32.gmra.mrb[50].mxu0 %vm447_vm0, %v7425_v29  ;;  %6311 = vmatmul.mubr.msk.f32.gmra.mrb[16].mxu1 %vm447_vm0, %v8163_v45  ;;  %v3993_v29 = vld [vmem:[#allocation2 + $0x230] sm:$0xff] }
 0x1dc   : > { %6116 = vmatprep.mubr.msk.f32.mxu0 %vm447_vm0, %v7433_v36  ;;  %6313 = vmatprep.mubr.msk.f32.mxu1 %vm447_vm0, %v8164_v48 }
 0x1df   : > { %6117 = vmatmul.mubr.msk.f32.gmra.mrb[52].mxu0 %vm447_vm0, %v7441_v7  ;;  %6314 = vmatmul.mubr.msk.f32.gmra.mrb[18].mxu1 %vm447_vm0, %v8165_v51  ;;  %v8169_v7 = vld [vmem:[#allocation18_spill] sm:$0xff] }
 0x1e0   : > { %6119 = vmatprep.mubr.msk.f32.mxu0 %vm447_vm0, %v7449_v42  ;;  %6316 = vmatprep.mubr.msk.f32.mxu1 %vm447_vm0, %v8166_v54  ;;  %v8170_v42 = vld [vmem:[#allocation19_spill] sm:$0xff] }
 0x1e3   : > { %6120 = vmatmul.mubr.msk.f32.gmra.mrb[54].mxu0 %vm447_vm0, %v7457_v0  ;;  %6317 = vmatmul.mubr.msk.f32.gmra.mrb[20].mxu1 %vm447_vm0, %v8167_v61  ;;  %v8171_v0 = vld [vmem:[#allocation20_spill] sm:$0xff] }
 0x1e4   : > { %6122 = vmatprep.mubr.msk.f32.mxu0 %vm447_vm0, %v7465_v59  ;;  %6319 = vmatprep.mubr.msk.f32.mxu1 %vm447_vm0, %v8168_v2  ;;  %v8172_v59 = vld [vmem:[#allocation21_spill] sm:$0xff] }
 0x1e7   : > { %6123 = vmatmul.mubr.msk.f32.gmra.mrb[56].mxu0 %vm447_vm0, %v7473_v47  ;;  %6320 = vmatmul.mubr.msk.f32.gmra.mrb[22].mxu1 %vm447_vm0, %v8169_v7  ;;  %v8173_v47 = vld [vmem:[#allocation22_spill] sm:$0xff] }
 0x1e8   : > { %6125 = vmatprep.mubr.msk.f32.mxu0 %vm447_vm0, %v7481_v32  ;;  %6322 = vmatprep.mubr.msk.f32.mxu1 %vm447_vm0, %v8170_v42  ;;  %v8174_v32 = vld [vmem:[#allocation23_spill] sm:$0xff] }
 0x1eb   : > { %6126 = vmatmul.mubr.msk.f32.gmra.mrb[58].mxu0 %vm447_vm0, %v7489_v13  ;;  %6323 = vmatmul.mubr.msk.f32.gmra.mrb[24].mxu1 %vm447_vm0, %v8171_v0  ;;  %v8175_v13 = vld [vmem:[#allocation24_spill] sm:$0xff] }
 0x1ec   : > { %6128 = vmatprep.mubr.msk.f32.mxu0 %vm447_vm0, %v7497_v60  ;;  %6325 = vmatprep.mubr.msk.f32.mxu1 %vm447_vm0, %v8172_v59  ;;  %v8176_v60 = vld [vmem:[#allocation25_spill] sm:$0xff] }
 0x1ef   : > { %6129 = vmatmul.mubr.msk.f32.gmra.mrb[60].mxu0 %vm447_vm0, %v7505_v39  ;;  %6326 = vmatmul.mubr.msk.f32.gmra.mrb[26].mxu1 %vm447_vm0, %v8173_v47  ;;  %v3992_v39 = vld [vmem:[#allocation2 + $0x228] sm:$0xff] }
 0x1f0   : > { %6131 = vmatprep.mubr.msk.f32.mxu0 %vm447_vm0, %v7513_v22  ;;  %6328 = vmatprep.mubr.msk.f32.mxu1 %vm447_vm0, %v8174_v32  ;;  %v8177_v22 = vld [vmem:[#allocation26_spill] sm:$0xff] }
 0x1f3   : > { %6132 = vmatmul.mubr.msk.f32.gmra.mrb[62].mxu0 %vm447_vm0, %v7521_v3  ;;  %6329 = vmatmul.mubr.msk.f32.gmra.mrb[28].mxu1 %vm447_vm0, %v8175_v13  ;;  %v8178_v3 = vld [vmem:[#allocation29_spill] sm:$0xff] }
 0x1f4   : > { %6134 = vmatprep.mubr.msk.f32.mxu0 %vm447_vm0, %v7662_v10  ;;  %6331 = vmatprep.mubr.msk.f32.mxu1 %vm447_vm0, %v8176_v60 }
 0x1f7   : > { %6135 = vmatmul.mubr.msk.f32.gmra.mrb[64].mxu0 %vm447_vm0, %v7668_v12  ;;  %6332 = vmatmul.mubr.msk.f32.gmra.mrb[30].mxu1 %vm447_vm0, %v8177_v22 }
 0x1f8   : > { %6334 = vmatprep.mubr.msk.f32.mxu1 %vm447_vm0, %v3992_v39 }
 0x1fb   : > { %6335 = vmatmul.mubr.msk.f32.gmra.mrb[32].mxu1 %vm447_vm0, %v3993_v29 }
 0x1fc   : > { %6339 = vmatprep.mubr.msk.f32.mxu1 %vm447_vm0, %v7307_v30 }
 0x1ff   : > { %6340 = vmatmul.mubr.msk.f32.vlgmr.msra.gmra.mrb[2].mxu1 %vm447_vm0, %v7315_v19 }
 0x200   : > { %6342 = vmatprep.mubr.msk.f32.mxu1 %vm447_vm0, %v7323_v20 }
 0x203   : > { %6343 = vmatmul.mubr.msk.f32.gmra.mrb[4].mxu1 %vm447_vm0, %v7331_v23 }
 0x204   : > { %6345 = vmatprep.mubr.msk.f32.mxu1 %vm447_vm0, %v7339_v25 }
 0x207   : > { %6346 = vmatmul.mubr.msk.f32.gmra.mrb[6].mxu1 %vm447_vm0, %v7347_v28 }
 0x208   : > { %6348 = vmatprep.mubr.msk.f32.mxu1 %vm447_vm0, %v7355_v33 }
 0x20b   : > { %6349 = vmatmul.mubr.msk.f32.gmra.mrb[8].mxu1 %vm447_vm0, %v7363_v38 }
 0x20c   : > { %6351 = vmatprep.mubr.msk.f32.mxu1 %vm447_vm0, %v7371_v41 }
 0x20f   : > { %6352 = vmatmul.mubr.msk.f32.gmra.mrb[10].mxu1 %vm447_vm0, %v7379_v46 }
 0x210   : > { %6354 = vmatprep.mubr.msk.f32.mxu1 %vm447_vm0, %v7387_v49 }
 0x213   : > { %6355 = vmatmul.mubr.msk.f32.gmra.mrb[12].mxu1 %vm447_vm0, %v7395_v53 }
 0x214   : > { %6357 = vmatprep.mubr.msk.f32.mxu1 %vm447_vm0, %v7403_v58 }
 0x217   : > { %6358 = vmatmul.mubr.msk.f32.gmra.mrb[14].mxu1 %vm447_vm0, %v7411_v62 }
 0x218   : > { %6360 = vmatprep.mubr.msk.f32.mxu1 %vm447_vm0, %v7419_v4 }
 0x21b   : > { %6361 = vmatmul.mubr.msk.f32.gmra.mrb[16].mxu1 %vm447_vm0, %v7427_v34 }
 0x21c   : > { %6363 = vmatprep.mubr.msk.f32.mxu1 %vm447_vm0, %v7435_v44 }
 0x21f   : > { %6364 = vmatmul.mubr.msk.f32.gmra.mrb[18].mxu1 %vm447_vm0, %v7443_v5 }
 0x220   : > { %6366 = vmatprep.mubr.msk.f32.mxu1 %vm447_vm0, %v7451_v1 }
 0x223   : > { %6367 = vmatmul.mubr.msk.f32.gmra.mrb[20].mxu1 %vm447_vm0, %v7459_v63 }
 0x224   : > { %6369 = vmatprep.mubr.msk.f32.mxu1 %vm447_vm0, %v7467_v57  ;;  %v8179_v57 = vld [vmem:[#allocation30_spill] sm:$0xff] }
 0x227   : > { %6370 = vmatmul.mubr.msk.f32.gmra.mrb[22].mxu1 %vm447_vm0, %v7475_v43  ;;  %v4382_v43 = vld [vmem:[#allocation2 + $0x229] sm:$0xff] }
 0x228   : > { %6372 = vmatprep.mubr.msk.f32.mxu1 %vm447_vm0, %v7483_v27  ;;  %v8180_v27 = vld [vmem:[#allocation31_spill] sm:$0xff] }
 0x22b   : > { %6373 = vmatmul.mubr.msk.f32.gmra.mrb[24].mxu1 %vm447_vm0, %v7491_v9  ;;  %v4383_v9 = vld [vmem:[#allocation2 + $0x231] sm:$0xff] }
 0x22c   : > { %6375 = vmatprep.mubr.msk.f32.mxu1 %vm447_vm0, %v7499_v56 }
 0x22f   : > { %6376 = vmatmul.mubr.msk.f32.gmra.mrb[26].mxu1 %vm447_vm0, %v7507_v35 }
 0x230   : > { %6378 = vmatprep.mubr.msk.f32.mxu1 %vm447_vm0, %v7515_v18 }
 0x233   : > { %6379 = vmatmul.mubr.msk.f32.gmra.mrb[28].mxu1 %vm447_vm0, %v8178_v3 }
 0x234   : > { %6381 = vmatprep.mubr.msk.f32.mxu1 %vm447_vm0, %v8179_v57  ;;  %v4942_v57 = vld [vmem:[%s6889_s10 + $0x8] sm:$0xff] }
 0x237   : > { %6382 = vmatmul.mubr.msk.f32.gmra.mrb[30].mxu1 %vm447_vm0, %v8180_v27 }
 0x238   : > { %6384 = vmatprep.mubr.msk.f32.mxu1 %vm447_vm0, %v4382_v43 }
 0x23b   : > { %6385 = vmatmul.mubr.msk.f32.gmra.mrb[32].mxu1 %vm447_vm0, %v4383_v9 }
 0x28e   : > { %v6091_v56 = vpop.f32.mrb[34].mxu0 }
 0x28f   : > { %v2600_v35 = vpop.f32.mrb[35].mxu0 }
 0x292   : > { %v6094_v63 = vpop.f32.mrb[36].mxu0 }
 0x293   : > { %v2610_v1 = vpop.f32.mrb[37].mxu0 }
 0x296   : > { %v6097_v18 = vpop.f32.mrb[38].mxu0 }
 0x297   : > { %v2620_v5 = vpop.f32.mrb[39].mxu0 }
 0x29a   : > { %v7860_v30 = vpop.f32.mrb[40].mxu0 }
 0x29b   : > { %v7862_v19 = vpop.f32.mrb[41].mxu0 }
 0x29e   : > { %v7864_v20 = vpop.f32.mrb[42].mxu0 }
 0x29f   : > { %v7866_v23 = vpop.f32.mrb[43].mxu0 }
 0x2a2   : > { %v7868_v25 = vpop.f32.mrb[44].mxu0 }
 0x2a3   : > { %v7870_v28 = vpop.f32.mrb[45].mxu0 }
 0x2a6   : > { %v7872_v33 = vpop.f32.mrb[46].mxu0 }
 0x2a7   : > { %v7874_v38 = vpop.f32.mrb[47].mxu0 }
 0x2aa   : > { %v7876_v41 = vpop.f32.mrb[48].mxu0 }
 0x2ab   : > { %v7878_v46 = vpop.f32.mrb[49].mxu0 }
 0x2ae   : > { %v7880_v49 = vpop.f32.mrb[50].mxu0 }
 0x2af   : > { %v7882_v53 = vpop.f32.mrb[51].mxu0 }
 0x2b2   : > { %v7884_v58 = vpop.f32.mrb[52].mxu0 }
 0x2b3   : > { %v7886_v62 = vpop.f32.mrb[53].mxu0 }
 0x2b6   : > { %v7888_v4 = vpop.f32.mrb[54].mxu0 }
 0x2b7   : > { %v7890_v34 = vpop.f32.mrb[55].mxu0 }
 0x2ba   : > { %v7892_v36 = vpop.f32.mrb[56].mxu0 }
 0x2bb   : > { %v7894_v44 = vpop.f32.mrb[57].mxu0 }
 0x2be   : > { %v7896_v6 = vpop.f32.mrb[58].mxu0 }
 0x2bf   : > { %v7898_v10 = vpop.f32.mrb[59].mxu0 }
 0x2c2   : > { %v7900_v12 = vpop.f32.mrb[60].mxu0 }
 0x2c3   : > { %v7902_v14 = vpop.f32.mrb[61].mxu0 }
 0x2c6   : > { %v7904_v15 = vpop.f32.mrb[62].mxu0 }
 0x2c7   : > { %v7906_v8 = vpop.f32.mrb[63].mxu0 }
 0x2ca   : > { %v7908_v11 = vpop.f32.mrb[64].mxu0 }
 0x2cb   : > { %v7910_v50 = vpop.f32.mrb[65].mxu0 }
 0x2d2   : > { %v6341_v55 = vpop.f32.mrb[2].mxu1 }
 0x2d3   : > { %v6387_v17 = vadd.f32 %v6341_v55, %v6091_v56  ;;  %v4551_v52 = vpop.f32.mrb[3].mxu1 }
 0x2d4   : > { %v6388_v21 = vadd.f32 %v4551_v52, %v2600_v35 }
 0x2d5   : > { %v4750_v24 = vadd.f32 %v6387_v17, %v7915_v16 }
 0x2d6   : > { %v4749_v26 = vadd.f32 %v6388_v21, %v7915_v16  ;;  %v6344_v31 = vpop.f32.mrb[4].mxu1 }
 0x2d7   : > { %v4782_v37 = vadd.f32 3.0, %v4750_v24  ;;  %v6389_v40 = vadd.f32 %v6344_v31, %v6094_v63  ;;  %v4561_v45 = vpop.f32.mrb[5].mxu1  ;;  %v4941_v63 = vld [vmem:[%s6889_s10] sm:$0xff] }
 0x2d8   : > { %v4781_v48 = vadd.f32 3.0, %v4749_v26  ;;  %v6390_v51 = vadd.f32 %v4561_v45, %v2610_v1  ;;  %v4944_v45 = vld [vmem:[%s6889_s10 + $0x18] sm:$0xff] }
 0x2d9   : > { %v4814_v54 = vmax.f32 %v4782_v37, 0.0  ;;  %v4752_v61 = vadd.f32 %v6389_v40, %v7915_v16 }
 0x2da   : > { %v4813_v2 = vmax.f32 %v4781_v48, 0.0  ;;  %v4751_v7 = vadd.f32 %v6390_v51, %v7915_v16  ;;  %v6347_v42 = vpop.f32.mrb[6].mxu1 }
 0x2db   : > { %v4846_v0 = vmin.f32 %v4814_v54, 6.0  ;;  %v4784_v59 = vadd.f32 3.0, %v4752_v61  ;;  %v6391_v47 = vadd.f32 %v6347_v42, %v6097_v18  ;;  %v4571_v32 = vpop.f32.mrb[7].mxu1 }
 0x2dc   : > { %v4845_v13 = vmin.f32 %v4813_v2, 6.0  ;;  %v4783_v60 = vadd.f32 3.0, %v4751_v7  ;;  %v6392_v39 = vadd.f32 %v4571_v32, %v2620_v5 }
 0x2dd   : > { %v4878_v22 = vmul.f32 %v4846_v0, %v4750_v24  ;;  %v4816_v29 = vmax.f32 %v4784_v59, 0.0  ;;  %v4754_v3 = vadd.f32 %v6391_v47, %v7915_v16  ;;  %v4943_v0 = vld [vmem:[%s6889_s10 + $0x10] sm:$0xff] }
 0x2de   : > { %v4877_v43 = vmul.f32 %v4845_v13, %v4749_v26  ;;  %v4815_v27 = vmax.f32 %v4783_v60, 0.0  ;;  %v4753_v9 = vadd.f32 %v6392_v39, %v7915_v16  ;;  %v6350_v56 = vpop.f32.mrb[8].mxu1 }
 0x2df   : > { %v4910_v35 = vmul.f32 0.16666667, %v4878_v22  ;;  %v4848_v1 = vmin.f32 %v4816_v29, 6.0  ;;  %v4786_v18 = vadd.f32 3.0, %v4754_v3  ;;  %v6393_v55 = vadd.f32 %v6350_v56, %v7860_v30  ;;  %v4581_v17 = vpop.f32.mrb[9].mxu1 }
 0x2e0   : > { %v4909_v5 = vmul.f32 0.16666667, %v4877_v43  ;;  %v4847_v52 = vmin.f32 %v4815_v27, 6.0  ;;  %v4785_v21 = vadd.f32 3.0, %v4753_v9  ;;  %v6394_v24 = vadd.f32 %v4581_v17, %v7862_v19  ;;  %v4946_v27 = vld [vmem:[%s6889_s10 + $0x28] sm:$0xff] }
 0x2e1   : > { %v4974_v26 = vadd.f32 %v4942_v57, %v4910_v35  ;;  %v4880_v31 = vmul.f32 %v4848_v1, %v4752_v61  ;;  %v4818_v37 = vmax.f32 %v4786_v18, 0.0  ;;  %v4756_v40 = vadd.f32 %v6393_v55, %v7915_v16  ;;  %v4945_v18 = vld [vmem:[%s6889_s10 + $0x20] sm:$0xff] }
 0x2e2   : > { %v4973_v30 = vadd.f32 %v4941_v63, %v4909_v5  ;;  %v4879_v48 = vmul.f32 %v4847_v52, %v4751_v7  ;;  %v4817_v51 = vmax.f32 %v4785_v21, 0.0  ;;  %v4755_v54 = vadd.f32 %v6394_v24, %v7915_v16  ;;  %v6353_v2 = vpop.f32.mrb[10].mxu1 }
 0x2e3   : > { %5006 = vst.msk [vmem:[%s7930_s24 + $0x8] sm:$0xff] %vm561_vm1, %v4974_v26  ;;  %v4912_v42 = vmul.f32 0.16666667, %v4880_v31  ;;  %v4850_v59 = vmin.f32 %v4818_v37, 6.0  ;;  %v4788_v19 = vadd.f32 3.0, %v4756_v40  ;;  %v6395_v61 = vadd.f32 %v6353_v2, %v7864_v20  ;;  %v4591_v47 = vpop.f32.mrb[11].mxu1 }
 0x2e4   : > { %5005 = vst.msk [vmem:[%s7930_s24] sm:$0xff] %vm561_vm1, %v4973_v30  ;;  %v4911_v32 = vmul.f32 0.16666667, %v4879_v48  ;;  %v4849_v7 = vmin.f32 %v4817_v51, 6.0  ;;  %v4787_v13 = vadd.f32 3.0, %v4755_v54  ;;  %v6396_v60 = vadd.f32 %v4591_v47, %v7866_v23 }
 0x2e5   : > { %v4976_v39 = vadd.f32 %v4944_v45, %v4912_v42  ;;  %v4882_v22 = vmul.f32 %v4850_v59, %v4754_v3  ;;  %v4820_v29 = vmax.f32 %v4788_v19, 0.0  ;;  %v4758_v57 = vadd.f32 %v6395_v61, %v7915_v16  ;;  %v4948_v45 = vld [vmem:[%s6889_s10 + $0x38] sm:$0xff] }
 0x2e6   : > { %v4975_v43 = vadd.f32 %v4943_v0, %v4911_v32  ;;  %v4881_v56 = vmul.f32 %v4849_v7, %v4753_v9  ;;  %v4819_v20 = vmax.f32 %v4787_v13, 0.0  ;;  %v4757_v35 = vadd.f32 %v6396_v60, %v7915_v16  ;;  %v6356_v63 = vpop.f32.mrb[12].mxu1  ;;  %v4947_v0 = vld [vmem:[%s6889_s10 + $0x30] sm:$0xff] }
 0x2e7   : > { %5008 = vst.msk [vmem:[%s7930_s24 + $0x18] sm:$0xff] %vm561_vm1, %v4976_v39  ;;  %v4914_v1 = vmul.f32 0.16666667, %v4882_v22  ;;  %v4852_v55 = vmin.f32 %v4820_v29, 6.0  ;;  %v4790_v23 = vadd.f32 3.0, %v4758_v57  ;;  %v6397_v3 = vadd.f32 %v6356_v63, %v7868_v25  ;;  %v4601_v17 = vpop.f32.mrb[13].mxu1 }
 0x2e8   : > { %5007 = vst.msk [vmem:[%s7930_s24 + $0x10] sm:$0xff] %vm561_vm1, %v4975_v43  ;;  %v4913_v5 = vmul.f32 0.16666667, %v4881_v56  ;;  %v4851_v9 = vmin.f32 %v4819_v20, 6.0  ;;  %v4789_v52 = vadd.f32 3.0, %v4757_v35  ;;  %v6398_v21 = vadd.f32 %v4601_v17, %v7870_v28  ;;  %v4950_v29 = vld [vmem:[%s6889_s10 + $0x48] sm:$0xff] }
 0x2e9   : > { %v4978_v24 = vadd.f32 %v4946_v27, %v4914_v1  ;;  %v4884_v26 = vmul.f32 %v4852_v55, %v4756_v40  ;;  %v4822_v31 = vmax.f32 %v4790_v23, 0.0  ;;  %v4760_v37 = vadd.f32 %v6397_v3, %v7915_v16  ;;  %v4949_v63 = vld [vmem:[%s6889_s10 + $0x40] sm:$0xff] }
 0x2ea   : > { %v4977_v30 = vadd.f32 %v4945_v18, %v4913_v5  ;;  %v4883_v48 = vmul.f32 %v4851_v9, %v4755_v54  ;;  %v4821_v25 = vmax.f32 %v4789_v52, 0.0  ;;  %v4759_v51 = vadd.f32 %v6398_v21, %v7915_v16  ;;  %v6359_v2 = vpop.f32.mrb[14].mxu1 }
 0x2eb   : > { %5010 = vst.msk [vmem:[%s7930_s24 + $0x28] sm:$0xff] %vm561_vm1, %v4978_v24  ;;  %v4916_v42 = vmul.f32 0.16666667, %v4884_v26  ;;  %v4854_v59 = vmin.f32 %v4822_v31, 6.0  ;;  %v4792_v28 = vadd.f32 3.0, %v4760_v37  ;;  %v6399_v40 = vadd.f32 %v6359_v2, %v7872_v33  ;;  %v4611_v19 = vpop.f32.mrb[15].mxu1 }
 0x2ec   : > { %5009 = vst.msk [vmem:[%s7930_s24 + $0x20] sm:$0xff] %vm561_vm1, %v4977_v30  ;;  %v4915_v61 = vmul.f32 0.16666667, %v4883_v48  ;;  %v4853_v54 = vmin.f32 %v4821_v25, 6.0  ;;  %v4791_v47 = vadd.f32 3.0, %v4759_v51  ;;  %v6400_v32 = vadd.f32 %v4611_v19, %v7874_v38  ;;  %v4952_v24 = vld [vmem:[%s6889_s10 + $0x58] sm:$0xff] }
 0x2ed   : > { %v4980_v7 = vadd.f32 %v4948_v45, %v4916_v42  ;;  %v4886_v13 = vmul.f32 %v4854_v59, %v4758_v57  ;;  %v4824_v60 = vmax.f32 %v4792_v28, 0.0  ;;  %v4762_v39 = vadd.f32 %v6399_v40, %v7915_v16  ;;  %v4951_v48 = vld [vmem:[%s6889_s10 + $0x50] sm:$0xff] }
 0x2ee   : > { %v4979_v22 = vadd.f32 %v4947_v0, %v4915_v61  ;;  %v4885_v43 = vmul.f32 %v4853_v54, %v4757_v35  ;;  %v4823_v33 = vmax.f32 %v4791_v47, 0.0  ;;  %v4761_v27 = vadd.f32 %v6400_v32, %v7915_v16  ;;  %v6362_v56 = vpop.f32.mrb[16].mxu1  ;;  %v4954_v47 = vld [vmem:[%s6889_s10 + $0x68] sm:$0xff] }
 0x2ef   : > { %5012 = vst.msk [vmem:[%s7930_s24 + $0x38] sm:$0xff] %vm561_vm1, %v4980_v7  ;;  %v4918_v20 = vmul.f32 0.16666667, %v4886_v13  ;;  %v4856_v1 = vmin.f32 %v4824_v60, 6.0  ;;  %v4794_v38 = vadd.f32 3.0, %v4762_v39  ;;  %v6401_v57 = vadd.f32 %v6362_v56, %v7876_v41  ;;  %v4621_v18 = vpop.f32.mrb[17].mxu1 }
 0x2f0   : > { %5011 = vst.msk [vmem:[%s7930_s24 + $0x30] sm:$0xff] %vm561_vm1, %v4979_v22  ;;  %v4917_v55 = vmul.f32 0.16666667, %v4885_v43  ;;  %v4855_v35 = vmin.f32 %v4823_v33, 6.0  ;;  %v4793_v23 = vadd.f32 3.0, %v4761_v27  ;;  %v6402_v3 = vadd.f32 %v4621_v18, %v7878_v46  ;;  %v4953_v22 = vld [vmem:[%s6889_s10 + $0x60] sm:$0xff] }
 0x2f1   : > { %v4982_v17 = vadd.f32 %v4950_v29, %v4918_v20  ;;  %v4888_v5 = vmul.f32 %v4856_v1, %v4760_v37  ;;  %v4826_v9 = vmax.f32 %v4794_v38, 0.0  ;;  %v4764_v52 = vadd.f32 %v6401_v57, %v7915_v16 }
 0x2f2   : > { %v4981_v21 = vadd.f32 %v4949_v63, %v4917_v55  ;;  %v4887_v26 = vmul.f32 %v4855_v35, %v4759_v51  ;;  %v4825_v41 = vmax.f32 %v4793_v23, 0.0  ;;  %v4763_v31 = vadd.f32 %v6402_v3, %v7915_v16  ;;  %v6365_v30 = vpop.f32.mrb[18].mxu1  ;;  %v4956_v55 = vld [vmem:[%s6889_s10 + $0x78] sm:$0xff] }
 0x2f3   : > { %5014 = vst.msk [vmem:[%s7930_s24 + $0x48] sm:$0xff] %vm561_vm1, %v4982_v17  ;;  %v4920_v45 = vmul.f32 0.16666667, %v4888_v5  ;;  %v4858_v25 = vmin.f32 %v4826_v9, 6.0  ;;  %v4796_v46 = vadd.f32 3.0, %v4764_v52  ;;  %v6403_v37 = vadd.f32 %v6365_v30, %v7880_v49  ;;  %v4631_v2 = vpop.f32.mrb[19].mxu1 }
 0x2f4   : > { %5013 = vst.msk [vmem:[%s7930_s24 + $0x40] sm:$0xff] %vm561_vm1, %v4981_v21  ;;  %v4919_v42 = vmul.f32 0.16666667, %v4887_v26  ;;  %v4857_v51 = vmin.f32 %v4825_v41, 6.0  ;;  %v4795_v0 = vadd.f32 3.0, %v4763_v31  ;;  %v6404_v59 = vadd.f32 %v4631_v2, %v7882_v53  ;;  %v4955_v5 = vld [vmem:[%s6889_s10 + $0x70] sm:$0xff] }
 0x2f5   : > { %v4984_v28 = vadd.f32 %v4952_v24, %v4920_v45  ;;  %v4890_v40 = vmul.f32 %v4858_v25, %v4762_v39  ;;  %v4828_v19 = vmax.f32 %v4796_v46, 0.0  ;;  %v4766_v61 = vadd.f32 %v6403_v37, %v7915_v16  ;;  %v4958_v37 = vld [vmem:[%s6889_s10 + $0x88] sm:$0xff] }
 0x2f6   : > { %v4983_v54 = vadd.f32 %v4951_v48, %v4919_v42  ;;  %v4889_v32 = vmul.f32 %v4857_v51, %v4761_v27  ;;  %v4827_v49 = vmax.f32 %v4795_v0, 0.0  ;;  %v4765_v7 = vadd.f32 %v6404_v59, %v7915_v16  ;;  %v6368_v13 = vpop.f32.mrb[20].mxu1  ;;  %v4957_v59 = vld [vmem:[%s6889_s10 + $0x80] sm:$0xff] }
 0x2f7   : > { %5016 = vst.msk [vmem:[%s7930_s24 + $0x58] sm:$0xff] %vm561_vm1, %v4984_v28  ;;  %v4922_v60 = vmul.f32 0.16666667, %v4890_v40  ;;  %v4860_v29 = vmin.f32 %v4828_v19, 6.0  ;;  %v4798_v53 = vadd.f32 3.0, %v4766_v61  ;;  %v6405_v39 = vadd.f32 %v6368_v13, %v7884_v58  ;;  %v4641_v43 = vpop.f32.mrb[21].mxu1 }
 0x2f8   : > { %5015 = vst.msk [vmem:[%s7930_s24 + $0x50] sm:$0xff] %vm561_vm1, %v4983_v54  ;;  %v4921_v33 = vmul.f32 0.16666667, %v4889_v32  ;;  %v4859_v27 = vmin.f32 %v4827_v49, 6.0  ;;  %v4797_v56 = vadd.f32 3.0, %v4765_v7  ;;  %v6406_v20 = vadd.f32 %v4641_v43, %v7886_v62 }
 0x2f9   : > { %v4986_v63 = vadd.f32 %v4954_v47, %v4922_v60  ;;  %v4892_v1 = vmul.f32 %v4860_v29, %v4764_v52  ;;  %v4830_v38 = vmax.f32 %v4798_v53, 0.0  ;;  %v4768_v57 = vadd.f32 %v6405_v39, %v7915_v16  ;;  %v4960_v29 = vld [vmem:[%s6889_s10 + $0x98] sm:$0xff] }
 0x2fa   : > { %v4985_v18 = vadd.f32 %v4953_v22, %v4921_v33  ;;  %v4891_v35 = vmul.f32 %v4859_v27, %v4763_v31  ;;  %v4829_v58 = vmax.f32 %v4797_v56, 0.0  ;;  %v4767_v23 = vadd.f32 %v6406_v20, %v7915_v16  ;;  %v6371_v3 = vpop.f32.mrb[22].mxu1  ;;  %v4959_v27 = vld [vmem:[%s6889_s10 + $0x90] sm:$0xff] }
 0x2fb   : > { %5018 = vst.msk [vmem:[%s7930_s24 + $0x68] sm:$0xff] %vm561_vm1, %v4986_v63  ;;  %v4924_v17 = vmul.f32 0.16666667, %v4892_v1  ;;  %v4862_v9 = vmin.f32 %v4830_v38, 6.0  ;;  %v4800_v62 = vadd.f32 3.0, %v4768_v57  ;;  %v6407_v52 = vadd.f32 %v6371_v3, %v7888_v4  ;;  %v4651_v21 = vpop.f32.mrb[23].mxu1 }
 0x2fc   : > { %5017 = vst.msk [vmem:[%s7930_s24 + $0x60] sm:$0xff] %vm561_vm1, %v4985_v18  ;;  %v4923_v24 = vmul.f32 0.16666667, %v4891_v35  ;;  %v4861_v26 = vmin.f32 %v4829_v58, 6.0  ;;  %v4799_v41 = vadd.f32 3.0, %v4767_v23  ;;  %v6408_v31 = vadd.f32 %v4651_v21, %v7890_v34  ;;  %v4961_v21 = vld [vmem:[%s6889_s10 + $0xa0] sm:$0xff] }
 0x2fd   : > { %v4988_v30 = vadd.f32 %v4956_v55, %v4924_v17  ;;  %v4894_v45 = vmul.f32 %v4862_v9, %v4766_v61  ;;  %v4832_v48 = vmax.f32 %v4800_v62, 0.0  ;;  %v4770_v25 = vadd.f32 %v6407_v52, %v7915_v16  ;;  %v4962_v17 = vld [vmem:[%s6889_s10 + $0xa8] sm:$0xff] }
 0x2fe   : > { %v4987_v46 = vadd.f32 %v4955_v5, %v4923_v24  ;;  %v4893_v2 = vmul.f32 %v4861_v26, %v4765_v7  ;;  %v4831_v4 = vmax.f32 %v4799_v41, 0.0  ;;  %v4769_v42 = vadd.f32 %v6408_v31, %v7915_v16  ;;  %v6374_v51 = vpop.f32.mrb[24].mxu1 }
 0x2ff   : > { %5020 = vst.msk [vmem:[%s7930_s24 + $0x78] sm:$0xff] %vm561_vm1, %v4988_v30  ;;  %v4926_v0 = vmul.f32 0.16666667, %v4894_v45  ;;  %v4864_v28 = vmin.f32 %v4832_v48, 6.0  ;;  %v4802_v34 = vadd.f32 3.0, %v4770_v25  ;;  %v6409_v40 = vadd.f32 %v6374_v51, %v7892_v36  ;;  %v4661_v19 = vpop.f32.mrb[25].mxu1 }
 0x300   : > { %5019 = vst.msk [vmem:[%s7930_s24 + $0x70] sm:$0xff] %vm561_vm1, %v4987_v46  ;;  %v4925_v61 = vmul.f32 0.16666667, %v4893_v2  ;;  %v4863_v54 = vmin.f32 %v4831_v4, 6.0  ;;  %v4801_v47 = vadd.f32 3.0, %v4769_v42  ;;  %v6410_v32 = vadd.f32 %v4661_v19, %v7894_v44 }
 0x301   : > { %v4990_v49 = vadd.f32 %v4958_v37, %v4926_v0  ;;  %v4896_v7 = vmul.f32 %v4864_v28, %v4768_v57  ;;  %v4834_v13 = vmax.f32 %v4802_v34, 0.0  ;;  %v4772_v60 = vadd.f32 %v6409_v40, %v7915_v16  ;;  %v4963_v34 = vld [vmem:[%s6889_s10 + $0xb0] sm:$0xff] }
 0x302   : > { %v4989_v22 = vadd.f32 %v4957_v59, %v4925_v61  ;;  %v4895_v53 = vmul.f32 %v4863_v54, %v4767_v23  ;;  %v4833_v36 = vmax.f32 %v4801_v47, 0.0  ;;  %v4771_v39 = vadd.f32 %v6410_v32, %v7915_v16  ;;  %v6377_v43 = vpop.f32.mrb[26].mxu1 }
 0x303   : > { %5022 = vst.msk [vmem:[%s7930_s24 + $0x88] sm:$0xff] %vm561_vm1, %v4990_v49  ;;  %v4928_v33 = vmul.f32 0.16666667, %v4896_v7  ;;  %v4866_v56 = vmin.f32 %v4834_v13, 6.0  ;;  %v4804_v44 = vadd.f32 3.0, %v4772_v60  ;;  %v6411_v20 = vadd.f32 %v6377_v43, %v7896_v6  ;;  %v4671_v63 = vpop.f32.mrb[27].mxu1 }
 0x304   : > { %5021 = vst.msk [vmem:[%s7930_s24 + $0x80] sm:$0xff] %vm561_vm1, %v4989_v22  ;;  %v4927_v1 = vmul.f32 0.16666667, %v4895_v53  ;;  %v4865_v38 = vmin.f32 %v4833_v36, 6.0  ;;  %v4803_v57 = vadd.f32 3.0, %v4771_v39  ;;  %v6412_v18 = vadd.f32 %v4671_v63, %v7898_v10  ;;  %v4966_v53 = vld [vmem:[%s6889_s10 + $0xc8] sm:$0xff] }
 0x305   : > { %v4992_v55 = vadd.f32 %v4960_v29, %v4928_v33  ;;  %v4898_v35 = vmul.f32 %v4866_v56, %v4770_v25  ;;  %v4836_v58 = vmax.f32 %v4804_v44, 0.0  ;;  %v4774_v23 = vadd.f32 %v6411_v20, %v7915_v16 }
 0x306   : > { %v4991_v3 = vadd.f32 %v4959_v27, %v4927_v1  ;;  %v4897_v5 = vmul.f32 %v4865_v38, %v4769_v42  ;;  %v4835_v6 = vmax.f32 %v4803_v57, 0.0  ;;  %v4773_v9 = vadd.f32 %v6412_v18, %v7915_v16  ;;  %v6380_v62 = vpop.f32.mrb[28].mxu1  ;;  %v4964_v42 = vld [vmem:[%s6889_s10 + $0xb8] sm:$0xff]  ;;  %v4965_v27 = vld [vmem:[%s6889_s10 + $0xc0] sm:$0xff] }
 0x307   : > { %5024 = vst.msk [vmem:[%s7930_s24 + $0x98] sm:$0xff] %vm561_vm1, %v4992_v55  ;;  %v4930_v52 = vmul.f32 0.16666667, %v4898_v35  ;;  %v4868_v24 = vmin.f32 %v4836_v58, 6.0  ;;  %v4806_v10 = vadd.f32 3.0, %v4774_v23  ;;  %v6413_v26 = vadd.f32 %v6380_v62, %v7900_v12  ;;  %v4681_v41 = vpop.f32.mrb[29].mxu1 }
 0x308   : > { %5023 = vst.msk [vmem:[%s7930_s24 + $0x90] sm:$0xff] %vm561_vm1, %v4991_v3  ;;  %v4929_v31 = vmul.f32 0.16666667, %v4897_v5  ;;  %v4867_v30 = vmin.f32 %v4835_v6, 6.0  ;;  %v4805_v45 = vadd.f32 3.0, %v4773_v9  ;;  %v6414_v48 = vadd.f32 %v4681_v41, %v7902_v14  ;;  %v4968_v3 = vld [vmem:[%s6889_s10 + $0xd8] sm:$0xff] }
 0x309   : > { %v4994_v25 = vadd.f32 %v4962_v17, %v4930_v52  ;;  %v4900_v46 = vmul.f32 %v4868_v24, %v4772_v60  ;;  %v4838_v37 = vmax.f32 %v4806_v10, 0.0  ;;  %v4776_v2 = vadd.f32 %v6413_v26, %v7915_v16 }
 0x30a   : > { %v4993_v4 = vadd.f32 %v4961_v21, %v4929_v31  ;;  %v4899_v51 = vmul.f32 %v4867_v30, %v4771_v39  ;;  %v4837_v12 = vmax.f32 %v4805_v45, 0.0  ;;  %v4775_v0 = vadd.f32 %v6414_v48, %v7915_v16  ;;  %v6383_v59 = vpop.f32.mrb[30].mxu1 }
 0x30b   : > { %5026 = vst.msk [vmem:[%s7930_s24 + $0xa8] sm:$0xff] %vm561_vm1, %v4994_v25  ;;  %v4932_v28 = vmul.f32 0.16666667, %v4900_v46  ;;  %v4870_v40 = vmin.f32 %v4838_v37, 6.0  ;;  %v4808_v14 = vadd.f32 3.0, %v4776_v2  ;;  %v6415_v19 = vadd.f32 %v6383_v59, %v7904_v15  ;;  %v4691_v61 = vpop.f32.mrb[31].mxu1 }
 0x30c   : > { %5025 = vst.msk [vmem:[%s7930_s24 + $0xa0] sm:$0xff] %vm561_vm1, %v4993_v4  ;;  %v4931_v54 = vmul.f32 0.16666667, %v4899_v51  ;;  %v4869_v47 = vmin.f32 %v4837_v12, 6.0  ;;  %v4807_v32 = vadd.f32 3.0, %v4775_v0  ;;  %v6416_v49 = vadd.f32 %v4691_v61, %v7906_v8  ;;  %v4969_v25 = vld [vmem:[%s6889_s10 + $0xe0] sm:$0xff] }
 0x30d   : > { %v4996_v7 = vadd.f32 %v4964_v42, %v4932_v28  ;;  %v4902_v13 = vmul.f32 %v4870_v40, %v4774_v23  ;;  %v4840_v60 = vmax.f32 %v4808_v14, 0.0  ;;  %v4778_v22 = vadd.f32 %v6415_v19, %v7915_v16  ;;  %v4972_v12 = vld [vmem:[%s6889_s10 + $0xf8] sm:$0xff]  ;;  %v4971_v28 = vld [vmem:[%s6889_s10 + $0xf0] sm:$0xff] }
 0x30e   : > { %v4995_v29 = vadd.f32 %v4963_v34, %v4931_v54  ;;  %v4901_v36 = vmul.f32 %v4869_v47, %v4773_v9  ;;  %v4839_v15 = vmax.f32 %v4807_v32, 0.0  ;;  %v4777_v39 = vadd.f32 %v6416_v49, %v7915_v16  ;;  %v6386_v43 = vpop.f32.mrb[32].mxu1  ;;  %v4967_v9 = vld [vmem:[%s6889_s10 + $0xd0] sm:$0xff] }
 0x30f   : > { %5028 = vst.msk [vmem:[%s7930_s24 + $0xb8] sm:$0xff] %vm561_vm1, %v4996_v7  ;;  %v4934_v33 = vmul.f32 0.16666667, %v4902_v13  ;;  %v4872_v56 = vmin.f32 %v4840_v60, 6.0  ;;  %v4810_v8 = vadd.f32 3.0, %v4778_v22  ;;  %v6417_v44 = vadd.f32 %v6386_v43, %v7908_v11  ;;  %v4701_v20 = vpop.f32.mrb[33].mxu1 }
 0x310   : > { %5027 = vst.msk [vmem:[%s7930_s24 + $0xb0] sm:$0xff] %vm561_vm1, %v4995_v29  ;;  %v4933_v63 = vmul.f32 0.16666667, %v4901_v36  ;;  %v4871_v1 = vmin.f32 %v4839_v15, 6.0  ;;  %v4809_v38 = vadd.f32 3.0, %v4777_v39  ;;  %v6418_v57 = vadd.f32 %v4701_v20, %v7910_v50 }
 0x311   : > { %v4998_v18 = vadd.f32 %v4966_v53, %v4934_v33  ;;  %v4904_v55 = vmul.f32 %v4872_v56, %v4776_v2  ;;  %v4842_v35 = vmax.f32 %v4810_v8, 0.0  ;;  %v4780_v58 = vadd.f32 %v6417_v44, %v7915_v16 }
 0x312   : > { %v4997_v23 = vadd.f32 %v4965_v27, %v4933_v63  ;;  %v4903_v17 = vmul.f32 %v4871_v1, %v4775_v0  ;;  %v4841_v11 = vmax.f32 %v4809_v38, 0.0  ;;  %v4779_v5 = vadd.f32 %v6418_v57, %v7915_v16  ;;  %v4970_v16 = vld [vmem:[%s6889_s10 + $0xe8] sm:$0xff] }
 0x313   : > { %5030 = vst.msk [vmem:[%s7930_s24 + $0xc8] sm:$0xff] %vm561_vm1, %v4998_v18  ;;  %v4936_v6 = vmul.f32 0.16666667, %v4904_v55  ;;  %v4874_v62 = vmin.f32 %v4842_v35, 6.0  ;;  %v4812_v50 = vadd.f32 3.0, %v4780_v58 }
 0x314   : > { %5029 = vst.msk [vmem:[%s7930_s24 + $0xc0] sm:$0xff] %vm561_vm1, %v4997_v23  ;;  %v4935_v52 = vmul.f32 0.16666667, %v4903_v17  ;;  %v4873_v21 = vmin.f32 %v4841_v11, 6.0  ;;  %v4811_v24 = vadd.f32 3.0, %v4779_v5 }
 0x315   : > { %v5000_v10 = vadd.f32 %v4968_v3, %v4936_v6  ;;  %v4906_v26 = vmul.f32 %v4874_v62, %v4778_v22  ;;  %v4844_v41 = vmax.f32 %v4812_v50, 0.0 }
 0x316   : > { %v4999_v31 = vadd.f32 %v4967_v9, %v4935_v52  ;;  %v4905_v30 = vmul.f32 %v4873_v21, %v4777_v39  ;;  %v4843_v45 = vmax.f32 %v4811_v24, 0.0 }
 0x317   : > { %5032 = vst.msk [vmem:[%s7930_s24 + $0xd8] sm:$0xff] %vm561_vm1, %v5000_v10  ;;  %v4938_v48 = vmul.f32 0.16666667, %v4906_v26  ;;  %v4876_v46 = vmin.f32 %v4844_v41, 6.0 }
 0x318   : > { %5031 = vst.msk [vmem:[%s7930_s24 + $0xd0] sm:$0xff] %vm561_vm1, %v4999_v31  ;;  %v4937_v37 = vmul.f32 0.16666667, %v4905_v30  ;;  %v4875_v2 = vmin.f32 %v4843_v45, 6.0 }
 0x319   : > { %v5002_v4 = vadd.f32 %v4970_v16, %v4938_v48  ;;  %v4908_v42 = vmul.f32 %v4876_v46, %v4780_v58 }
 0x31a   : > { %v5001_v51 = vadd.f32 %v4969_v25, %v4937_v37  ;;  %v4907_v0 = vmul.f32 %v4875_v2, %v4779_v5 }
 0x31b   : > { %5034 = vst.msk [vmem:[%s7930_s24 + $0xe8] sm:$0xff] %vm561_vm1, %v5002_v4  ;;  %v4940_v59 = vmul.f32 0.16666667, %v4908_v42 }
 0x31c   : > { %5033 = vst.msk [vmem:[%s7930_s24 + $0xe0] sm:$0xff] %vm561_vm1, %v5001_v51  ;;  %v4939_v34 = vmul.f32 0.16666667, %v4907_v0 }
 0x31d   : > { %v5004_v40 = vadd.f32 %v4972_v12, %v4940_v59 }
 0x31e   : > { %v5003_v14 = vadd.f32 %v4971_v28, %v4939_v34 }
 0x31f   : > { %5036 = vst.msk [vmem:[%s7930_s24 + $0xf8] sm:$0xff] %vm561_vm1, %v5004_v40 }
 0x320   : > { %5035 = vst.msk [vmem:[%s7930_s24 + $0xf0] sm:$0xff] %vm561_vm1, %v5003_v14 }
 0x321 PF: > { %s17_s26 = sadd.s32 1, %s6690_s26   ;;  %s8181_s24 = smov %s6686_s25 }
 0x322   : > { %p14_p5 = scmp.ge.s32.totalorder %s17_s26, 4   ;;  %s8182_s25 = smov %s8184_s27 }
 0x324   :  { %16 = sbr.rel (!%p14_p5) target bundleno = 2 (0x2), region = 95 }

</bundles_post_ra>
